<compile_context>
chip_gen: v7x
topology: tpu7x:2x2x1
jax: 0.10.0
libtpu: 0.0.40
codegen_flags: <defaults>
</compile_context>

<pallas_src>
import functools

import jax
import jax.numpy as jnp
import numpy as np
from jax.experimental import pallas as pl
from jax.experimental.pallas import tpu as pltpu


_NEG = np.float32(-1.0e30)          # large-negative pool padding (no inf edge cases)
_RES_KEYS = ("res0_conv0", "res0_conv1", "res1_conv0", "res1_conv1")


# -----------------------------------------------------------------------------
# Fused ConvSequence kernel (one grid step == one batch tile of Bt images)
# -----------------------------------------------------------------------------
def _conv_sequence_kernel(x_ref, stem_w_ref, stem_b_ref, res_w_ref, res_b_ref,
                          o_ref, stempad_ref, poolrows_ref, respad_ref,
                          *, bt, h, w, cin, cout):
    ho, wo = h // 2, w // 2
    nlanes = wo * cout                                   # 128 for the default sizes

    # --- border-only scratch init (tiny; redone every step -> megacore safe) ----
    stempad_ref[:, 0:1, :] = jnp.zeros((bt, 1, w * cin), stempad_ref.dtype)
    stempad_ref[:, h + 1:h + 2, :] = jnp.zeros((bt, 1, w * cin), stempad_ref.dtype)
    respad_ref[:, 0:1, :] = jnp.zeros((bt, 1, nlanes), respad_ref.dtype)
    respad_ref[:, ho + 1:ho + 2, :] = jnp.zeros((bt, 1, nlanes), respad_ref.dtype)
    poolrows_ref[:, 0:1, :] = jnp.full((bt, 1, nlanes), _NEG, jnp.float32)

    def conv3x3(pad_ref, act, wsel, bias_row, relu_input, rows):
        """3x3 / stride 1 / pad 1 conv of a lane-merged (bt, rows, width*C) act.

        One full-width store of the (ReLU'd) activation into the y-zero-padded
        scratch, then 3 matmuls (one per kernel row dy) against banded weights
        that already encode the dx taps, the x zero-padding and the output
        column layout.  f32 accumulation; bias fused.
        """
        if relu_input:
            # relu(zero_pad(x)) == zero_pad(relu(x)) -- fuse the ReLU here.
            act = jnp.maximum(act, 0.0)
        pad_ref[:, 1:rows + 1, :] = act.astype(pad_ref.dtype)
        k = pad_ref.shape[2]
        out = None
        for dy in range(3):
            lhs = pad_ref[:, dy:dy + rows, :].reshape(bt * rows, k)
            part = jnp.dot(lhs, wsel(dy), preferred_element_type=jnp.float32)
            out = part if out is None else out + part
        out = out + bias_row
        return out.reshape(bt, rows, out.shape[-1])

    # ---- stem conv: Cin -> Cout, emitted as 3 pool-tap groups of nlanes each ----
    s = conv3x3(stempad_ref, x_ref[...], lambda dy: stem_w_ref[dy],
                stem_b_ref[...], relu_input=False, rows=h)       # (bt, h, 3*nlanes)

    # ---- max_pool2d(kernel=3, stride=2, padding=1) ------------------------------
    # x direction was folded into the stem weight columns (group g holds the conv
    # output at x = 2j + g - 1; invalid columns carry a -1e30 bias), so it is an
    # elementwise max of three aligned, lane-dense groups.
    colmax = jnp.maximum(
        jnp.maximum(s[:, :, 0:nlanes], s[:, :, nlanes:2 * nlanes]),
        s[:, :, 2 * nlanes:3 * nlanes])                          # (bt, h, nlanes)
    # y direction: stride-2 row reads against a buffer with one -1e30 top row.
    poolrows_ref[:, 1:h + 1, :] = colmax
    a = jnp.maximum(
        jnp.maximum(poolrows_ref[:, pl.ds(0, ho, 2), :],
                    poolrows_ref[:, pl.ds(1, ho, 2), :]),
        poolrows_ref[:, pl.ds(2, ho, 2), :])                     # (bt, ho, nlanes)

    # ---- two residual blocks; activations stay resident on-chip -----------------
    for ci in range(4):
        if ci % 2 == 0:
            inputs = a
        a = conv3x3(respad_ref, a, lambda dy, ci=ci: res_w_ref[ci, dy],
                    res_b_ref[ci], relu_input=True, rows=ho)
        if ci % 2 == 1:
            a = a + inputs

    o_ref[...] = a.astype(o_ref.dtype)                           # (bt, ho, 128) store


# -----------------------------------------------------------------------------
# Host-side weight preparation: block-Toeplitz ("banded") conv matrices
# -----------------------------------------------------------------------------
def _banded_conv_matrices(w_kkio, in_width, col_to_x):
    """Embed a 3x3/pad-1 conv as 3 per-dy matmuls over lane-merged rows.

    w_kkio: (3, 3, ci, co).  Returns (3, in_width*ci, len(col_to_x)*co) where
    output lane block p computes the conv output at x = col_to_x[p]
    (col_to_x[p] is None -> all-zero columns).  Trace-safe (einsum only).
    """
    _, _, ci, co = w_kkio.shape
    nb = len(col_to_x)
    t = np.zeros((3, in_width, nb), np.float32)
    for p, x_out in enumerate(col_to_x):
        if x_out is None:
            continue
        for dx in range(3):
            x_in = x_out + dx - 1
            if 0 <= x_in < in_width:
                t[dx, x_in, p] = 1.0
    m = jnp.einsum("ydco,dip->yicpo", w_kkio.astype(jnp.float32), jnp.asarray(t))
    return m.reshape(3, in_width * ci, nb * co)


def _bias_row(b, col_to_x):
    """(1, len(col_to_x)*co) f32 bias row; invalid columns get -1e30 (pool pad)."""
    co = b.shape[0]
    pieces = [jnp.full((co,), _NEG, jnp.float32) if x is None
              else b.astype(jnp.float32) for x in col_to_x]
    return jnp.concatenate(pieces).reshape(1, -1)


def _pick_batch_tile(batch):
    """Largest per-step batch tile <= 8 that still leaves >= 2 grid steps
    (so both v7x TensorCores get work); falls back to the whole batch."""
    for bt in (8, 4, 2, 1):
        if batch % bt == 0 and batch // bt >= 2:
            return bt
    return batch


# -----------------------------------------------------------------------------
# Public forward: NCHW in / NCHW out, single fused pallas_call
# -----------------------------------------------------------------------------
def conv_sequence_forward(x_nchw, params, *, batch_tile=None, mxu_dtype=jnp.bfloat16):
    B, Cin, H, W = x_nchw.shape
    assert H % 2 == 0 and W % 2 == 0, "fused kernel assumes even spatial dims"
    Cout = params["conv"]["b"].shape[0]
    Ho, Wo = H // 2, W // 2
    nlanes = Wo * Cout

    Bt = _pick_batch_tile(B) if batch_tile is None else batch_tile
    assert B % Bt == 0

    # NCHW -> lane-merged (B, H, W*Cin).  The reshape after the transpose is free;
    # in an NHWC end-to-end model the boundary transposes disappear entirely.
    x = jnp.transpose(x_nchw, (0, 2, 3, 1)).reshape(B, H, W * Cin).astype(mxu_dtype)

    # Stem conv emits 3 pooling-tap groups: block p = g*Wo + j -> conv at x = 2j+g-1.
    stem_cols = [2 * j + g - 1 if 0 <= 2 * j + g - 1 < W else None
                 for g in range(3) for j in range(Wo)]
    stem_w = _banded_conv_matrices(params["conv"]["w_kkio"], W, stem_cols).astype(mxu_dtype)
    stem_b = _bias_row(params["conv"]["b"], stem_cols)                  # (1, 3*nlanes) f32

    res_cols = list(range(Wo))
    res_w = jnp.stack([_banded_conv_matrices(params[k]["w_kkio"], Wo, res_cols)
                       for k in _RES_KEYS]).astype(mxu_dtype)           # (4, 3, nl, nl)
    res_b = jnp.stack([_bias_row(params[k]["b"], res_cols)[0]
                       for k in _RES_KEYS])                             # (4, nlanes) f32

    kernel = functools.partial(_conv_sequence_kernel,
                               bt=Bt, h=H, w=W, cin=Cin, cout=Cout)

    out = pl.pallas_call(
        kernel,
        out_shape=jax.ShapeDtypeStruct((B, Ho, nlanes), jnp.float32),
        grid=(B // Bt,),
        in_specs=[
            pl.BlockSpec((Bt, H, W * Cin), lambda i: (i, 0, 0)),
            pl.BlockSpec(stem_w.shape, lambda i: (0, 0, 0)),
            pl.BlockSpec(stem_b.shape, lambda i: (0, 0)),
            pl.BlockSpec(res_w.shape, lambda i: (0, 0, 0, 0)),
            pl.BlockSpec(res_b.shape, lambda i: (0, 0)),
        ],
        out_specs=pl.BlockSpec((Bt, Ho, nlanes), lambda i: (i, 0, 0)),
        scratch_shapes=[
            pltpu.VMEM((Bt, H + 2, W * Cin), mxu_dtype),   # y-zero-padded stem input
            pltpu.VMEM((Bt, H + 1, nlanes), jnp.float32),  # pool rows (-1e30 top row)
            pltpu.VMEM((Bt, Ho + 2, nlanes), mxu_dtype),   # y-zero-padded res input
        ],
        # Scratch is ~26 KB/image after lane-merging, so the default scoped VMEM
        # limit is plenty on v5e/v6e/v7x; no vmem_limit_bytes override needed.
        compiler_params=pltpu.CompilerParams(dimension_semantics=("parallel",)),
    )(x, stem_w, stem_b, res_w, res_b)

    return jnp.transpose(out.reshape(B, Ho, Wo, Cout), (0, 3, 1, 2))    # -> NCHW


# -----------------------------------------------------------------------------
# Parameter init (replicates layer_init_normed: per-out-channel L2 norm = scale,
# zero bias).  Deterministic, in-script.
# -----------------------------------------------------------------------------
def init_conv(key, cin, cout, scale):
    w = jax.random.normal(key, (cout, cin, 3, 3), jnp.float32)          # PyTorch OIHW
    norm = jnp.sqrt(jnp.sum(w * w, axis=(1, 2, 3), keepdims=True))
    w = w * (scale / norm)
    b = jnp.zeros((cout,), jnp.float32)
    w_kkio = jnp.transpose(w, (2, 3, 1, 0))                             # (kh, kw, ci, co)
    return {"w_oihw": w, "w_kkio": w_kkio, "b": b}


def init_conv_sequence(key, in_channels, out_channels, scale):
    keys = jax.random.split(key, 5)
    nblocks = 2
    scale_rb = scale / np.sqrt(nblocks)        # scale passed to each ResidualBlock
    per_conv = np.sqrt(scale_rb)               # ResidualBlock takes sqrt internally
    return {
        "conv":       init_conv(keys[0], in_channels, out_channels, 1.0),
        "res0_conv0": init_conv(keys[1], out_channels, out_channels, per_conv),
        "res0_conv1": init_conv(keys[2], out_channels, out_channels, per_conv),
        "res1_conv0": init_conv(keys[3], out_channels, out_channels, per_conv),
        "res1_conv1": init_conv(keys[4], out_channels, out_channels, per_conv),
    }


# -----------------------------------------------------------------------------
# Pure-JAX reference (matches the PyTorch module semantics)
# -----------------------------------------------------------------------------
def _ref_conv(x, w, b):
    y = jax.lax.conv_general_dilated(
        x, w, window_strides=(1, 1), padding=((1, 1), (1, 1)),
        dimension_numbers=("NCHW", "OIHW", "NCHW"),
        precision=jax.lax.Precision.HIGHEST)
    return y + b[None, :, None, None]


def _ref_maxpool(x):
    return jax.lax.reduce_window(
        x, -jnp.inf, jax.lax.max,
        window_dimensions=(1, 1, 3, 3), window_strides=(1, 1, 2, 2),
        padding=((0, 0), (0, 0), (1, 1), (1, 1)))


def conv_sequence_reference(x, params):
    p = params["conv"]
    x = _ref_conv(x, p["w_oihw"], p["b"])
    x = _ref_maxpool(x)
    for blk in ("res0", "res1"):
        inputs = x
        p0, p1 = params[blk + "_conv0"], params[blk + "_conv1"]
        x = _ref_conv(jax.nn.relu(x), p0["w_oihw"], p0["b"])
        x = _ref_conv(jax.nn.relu(x), p1["w_oihw"], p1["b"]) + inputs
    return x


if __name__ == "__main__":
    key = jax.random.PRNGKey(0)
    kx, kp = jax.random.split(key)

    B, C, H, W = 2, 4, 16, 16                 # NCHW input, like the PyTorch module
    out_channels = 16
    scale = 1.0

    x = jax.random.normal(kx, (B, C, H, W), jnp.float32)
    params = init_conv_sequence(kp, C, out_channels, scale)
    y_ref = jax.block_until_ready(conv_sequence_reference(x, params))
    expected_shape = (B, out_channels, (H + 1) // 2, (W + 1) // 2)

    # Exact structural check: f32 MXU operands, tight tolerance.
    fwd_f32 = jax.jit(functools.partial(conv_sequence_forward, mxu_dtype=jnp.float32))
    y32 = jax.block_until_ready(fwd_f32(x, params))
    assert y32.shape == expected_shape, (y32.shape, expected_shape)
    np.testing.assert_allclose(np.asarray(y32), np.asarray(y_ref),
                               atol=1e-3, rtol=1e-3)

    # Default fast path: bf16 MXU operands, f32 accumulation (per v6e/v7x review).
    # Tolerance is loose only because the *reference* is full f32; accumulation
    # inside the kernel stays f32.
    y16 = jax.block_until_ready(jax.jit(conv_sequence_forward)(x, params))
    assert y16.shape == expected_shape, (y16.shape, expected_shape)
    np.testing.assert_allclose(np.asarray(y16), np.asarray(y_ref),
                               atol=1e-1, rtol=1e-1)

    print("KERNEL_OK")
</pallas_src>

<mosaic_0001>
module attributes {stable_mosaic.version = 11 : i64} {
  func.func @_conv_sequence_kernel(%arg0: i32, %arg1: memref<1x16x64xf32, #tpu.memory_space<vmem>>, %arg2: memref<3x64x384xf32, #tpu.memory_space<vmem>>, %arg3: memref<1x384xf32, #tpu.memory_space<vmem>>, %arg4: memref<4x3x128x128xf32, #tpu.memory_space<vmem>>, %arg5: memref<4x128xf32, #tpu.memory_space<vmem>>, %arg6: memref<1x8x128xf32, #tpu.memory_space<vmem>>, %arg7: memref<1x18x64xf32, #tpu.memory_space<vmem>>, %arg8: memref<1x17x128xf32, #tpu.memory_space<vmem>>, %arg9: memref<1x10x128xf32, #tpu.memory_space<vmem>>) attributes {dimension_semantics = [#tpu.dimension_semantics<parallel>], iteration_bounds = array<i64: 2>, scalar_prefetch = 0 : i64, scratch_operands = 3 : i64, tpu.core_type = #tpu.core_type<tc>, window_params = [{transform_indices = @transform_0, window_bounds = array<i64: 1, 16, 64>}, {pipeline_mode = #tpu.pipeline_mode<synchronous>, transform_indices = @transform_1, window_bounds = array<i64: 3, 64, 384>}, {pipeline_mode = #tpu.pipeline_mode<synchronous>, transform_indices = @transform_2, window_bounds = array<i64: 1, 384>}, {pipeline_mode = #tpu.pipeline_mode<synchronous>, transform_indices = @transform_3, window_bounds = array<i64: 4, 3, 128, 128>}, {pipeline_mode = #tpu.pipeline_mode<synchronous>, transform_indices = @transform_4, window_bounds = array<i64: 4, 128>}, {transform_indices = @transform_5, window_bounds = array<i64: 1, 8, 128>}]} {
    %cst = arith.constant 0.000000e+00 : f32
    %0 = vector.broadcast %cst : f32 to vector<1x1x64xf32>
    %c0 = arith.constant 0 : index
    %c0_0 = arith.constant 0 : index
    %c0_1 = arith.constant 0 : index
    %1 = vector.load %arg7[%c0, %c0_0, %c0_1] : memref<1x18x64xf32, #tpu.memory_space<vmem>>, vector<1x1x64xf32>
    tpu.vector_store %arg7[%c0, %c0_0, %c0_1], %0 {strides = array<i32>} : memref<1x18x64xf32, #tpu.memory_space<vmem>>, vector<1x1x64xf32>,
    %cst_2 = arith.constant 0.000000e+00 : f32
    %2 = vector.broadcast %cst_2 : f32 to vector<1x1x64xf32>
    %c0_3 = arith.constant 0 : index
    %c17 = arith.constant 17 : index
    %c0_4 = arith.constant 0 : index
    %3 = vector.load %arg7[%c0_3, %c17, %c0_4] : memref<1x18x64xf32, #tpu.memory_space<vmem>>, vector<1x1x64xf32>
    tpu.vector_store %arg7[%c0_3, %c17, %c0_4], %2 {strides = array<i32>} : memref<1x18x64xf32, #tpu.memory_space<vmem>>, vector<1x1x64xf32>,
    %cst_5 = arith.constant 0.000000e+00 : f32
    %4 = vector.broadcast %cst_5 : f32 to vector<1x1x128xf32>
    %c0_6 = arith.constant 0 : index
    %c0_7 = arith.constant 0 : index
    %c0_8 = arith.constant 0 : index
    %5 = vector.load %arg9[%c0_6, %c0_7, %c0_8] : memref<1x10x128xf32, #tpu.memory_space<vmem>>, vector<1x1x128xf32>
    tpu.vector_store %arg9[%c0_6, %c0_7, %c0_8], %4 {strides = array<i32>} : memref<1x10x128xf32, #tpu.memory_space<vmem>>, vector<1x1x128xf32>,
    %cst_9 = arith.constant 0.000000e+00 : f32
    %6 = vector.broadcast %cst_9 : f32 to vector<1x1x128xf32>
    %c0_10 = arith.constant 0 : index
    %c9 = arith.constant 9 : index
    %c0_11 = arith.constant 0 : index
    %7 = vector.load %arg9[%c0_10, %c9, %c0_11] : memref<1x10x128xf32, #tpu.memory_space<vmem>>, vector<1x1x128xf32>
    tpu.vector_store %arg9[%c0_10, %c9, %c0_11], %6 {strides = array<i32>} : memref<1x10x128xf32, #tpu.memory_space<vmem>>, vector<1x1x128xf32>,
    %cst_12 = arith.constant -1.000000e+30 : f32
    %8 = vector.broadcast %cst_12 : f32 to vector<1x1x128xf32>
    %c0_13 = arith.constant 0 : index
    %c0_14 = arith.constant 0 : index
    %c0_15 = arith.constant 0 : index
    %9 = vector.load %arg8[%c0_13, %c0_14, %c0_15] : memref<1x17x128xf32, #tpu.memory_space<vmem>>, vector<1x1x128xf32>
    tpu.vector_store %arg8[%c0_13, %c0_14, %c0_15], %8 {strides = array<i32>} : memref<1x17x128xf32, #tpu.memory_space<vmem>>, vector<1x1x128xf32>,
    %c0_16 = arith.constant 0 : index
    %c0_17 = arith.constant 0 : index
    %c0_18 = arith.constant 0 : index
    %10 = vector.load %arg1[%c0_16, %c0_17, %c0_18] : memref<1x16x64xf32, #tpu.memory_space<vmem>>, vector<1x16x64xf32>
    %c0_19 = arith.constant 0 : index
    %c0_20 = arith.constant 0 : index
    %11 = vector.load %arg3[%c0_19, %c0_20] : memref<1x384xf32, #tpu.memory_space<vmem>>, vector<1x384xf32>
    %c0_21 = arith.constant 0 : index
    %c1 = arith.constant 1 : index
    %c0_22 = arith.constant 0 : index
    %12 = vector.load %arg7[%c0_21, %c1, %c0_22] : memref<1x18x64xf32, #tpu.memory_space<vmem>>, vector<1x16x64xf32>
    tpu.vector_store %arg7[%c0_21, %c1, %c0_22], %10 {strides = array<i32>} : memref<1x18x64xf32, #tpu.memory_space<vmem>>, vector<1x16x64xf32>,
    %c0_23 = arith.constant 0 : index
    %c0_24 = arith.constant 0 : index
    %c0_25 = arith.constant 0 : index
    %13 = vector.load %arg7[%c0_23, %c0_24, %c0_25] : memref<1x18x64xf32, #tpu.memory_space<vmem>>, vector<1x16x64xf32>
    %14 = vector.shape_cast %13 : vector<1x16x64xf32> to vector<16x64xf32>
    %c0_26 = arith.constant 0 : index
    %c0_27 = arith.constant 0 : index
    %c0_28 = arith.constant 0 : index
    %15 = vector.load %arg2[%c0_26, %c0_27, %c0_28] : memref<3x64x384xf32, #tpu.memory_space<vmem>>, vector<1x64x384xf32>
    %16 = vector.shape_cast %15 : vector<1x64x384xf32> to vector<64x384xf32>
    %cst_29 = arith.constant dense<0.000000e+00> : vector<16x384xf32>
    %17 = tpu.matmul %14, %16, %cst_29 {dimension_numbers = #tpu.dot_dimension_numbers<[1], [0], [0], [1], [0, 0, 1, 1], [], []>} : vector<16x64xf32>, vector<64x384xf32>, vector<16x384xf32> -> vector<16x384xf32>
    %c0_30 = arith.constant 0 : index
    %c1_31 = arith.constant 1 : index
    %c0_32 = arith.constant 0 : index
    %18 = vector.load %arg7[%c0_30, %c1_31, %c0_32] : memref<1x18x64xf32, #tpu.memory_space<vmem>>, vector<1x16x64xf32>
    %19 = vector.shape_cast %18 : vector<1x16x64xf32> to vector<16x64xf32>
    %c1_33 = arith.constant 1 : index
    %c0_34 = arith.constant 0 : index
    %c0_35 = arith.constant 0 : index
    %20 = vector.load %arg2[%c1_33, %c0_34, %c0_35] : memref<3x64x384xf32, #tpu.memory_space<vmem>>, vector<1x64x384xf32>
    %21 = vector.shape_cast %20 : vector<1x64x384xf32> to vector<64x384xf32>
    %cst_36 = arith.constant dense<0.000000e+00> : vector<16x384xf32>
    %22 = tpu.matmul %19, %21, %cst_36 {dimension_numbers = #tpu.dot_dimension_numbers<[1], [0], [0], [1], [0, 0, 1, 1], [], []>} : vector<16x64xf32>, vector<64x384xf32>, vector<16x384xf32> -> vector<16x384xf32>
    %23 = arith.addf %17, %22 : vector<16x384xf32>
    %c0_37 = arith.constant 0 : index
    %c2 = arith.constant 2 : index
    %c0_38 = arith.constant 0 : index
    %24 = vector.load %arg7[%c0_37, %c2, %c0_38] : memref<1x18x64xf32, #tpu.memory_space<vmem>>, vector<1x16x64xf32>
    %25 = vector.shape_cast %24 : vector<1x16x64xf32> to vector<16x64xf32>
    %c2_39 = arith.constant 2 : index
    %c0_40 = arith.constant 0 : index
    %c0_41 = arith.constant 0 : index
    %26 = vector.load %arg2[%c2_39, %c0_40, %c0_41] : memref<3x64x384xf32, #tpu.memory_space<vmem>>, vector<1x64x384xf32>
    %27 = vector.shape_cast %26 : vector<1x64x384xf32> to vector<64x384xf32>
    %cst_42 = arith.constant dense<0.000000e+00> : vector<16x384xf32>
    %28 = tpu.matmul %25, %27, %cst_42 {dimension_numbers = #tpu.dot_dimension_numbers<[1], [0], [0], [1], [0, 0, 1, 1], [], []>} : vector<16x64xf32>, vector<64x384xf32>, vector<16x384xf32> -> vector<16x384xf32>
    %29 = arith.addf %23, %28 : vector<16x384xf32>
    %30 = vector.broadcast %11 : vector<1x384xf32> to vector<16x384xf32>
    %31 = arith.addf %29, %30 : vector<16x384xf32>
    %32 = vector.shape_cast %31 : vector<16x384xf32> to vector<1x16x384xf32>
    %33 = vector.extract_strided_slice %32 {offsets = [0, 0, 0], sizes = [1, 16, 128], strides = [1, 1, 1]} : vector<1x16x384xf32> to vector<1x16x128xf32>
    %34 = vector.extract_strided_slice %32 {offsets = [0, 0, 128], sizes = [1, 16, 128], strides = [1, 1, 1]} : vector<1x16x384xf32> to vector<1x16x128xf32>
    %35 = arith.maximumf %33, %34 : vector<1x16x128xf32>
    %36 = vector.extract_strided_slice %32 {offsets = [0, 0, 256], sizes = [1, 16, 128], strides = [1, 1, 1]} : vector<1x16x384xf32> to vector<1x16x128xf32>
    %37 = arith.maximumf %35, %36 : vector<1x16x128xf32>
    %c0_43 = arith.constant 0 : index
    %c1_44 = arith.constant 1 : index
    %c0_45 = arith.constant 0 : index
    %38 = vector.load %arg8[%c0_43, %c1_44, %c0_45] : memref<1x17x128xf32, #tpu.memory_space<vmem>>, vector<1x16x128xf32>
    tpu.vector_store %arg8[%c0_43, %c1_44, %c0_45], %37 {strides = array<i32>} : memref<1x17x128xf32, #tpu.memory_space<vmem>>, vector<1x16x128xf32>,
    %c0_46 = arith.constant 0 : index
    %c0_47 = arith.constant 0 : index
    %c0_48 = arith.constant 0 : index
    %39 = tpu.strided_load %arg8[%c0_46, %c0_47, %c0_48] {strides = array<i32: 1, 2, 1>} : memref<1x17x128xf32, #tpu.memory_space<vmem>>, vector<1x8x128xf32>
    %c0_49 = arith.constant 0 : index
    %c1_50 = arith.constant 1 : index
    %c0_51 = arith.constant 0 : index
    %40 = tpu.strided_load %arg8[%c0_49, %c1_50, %c0_51] {strides = array<i32: 1, 2, 1>} : memref<1x17x128xf32, #tpu.memory_space<vmem>>, vector<1x8x128xf32>
    %41 = arith.maximumf %39, %40 : vector<1x8x128xf32>
    %c0_52 = arith.constant 0 : index
    %c2_53 = arith.constant 2 : index
    %c0_54 = arith.constant 0 : index
    %42 = tpu.strided_load %arg8[%c0_52, %c2_53, %c0_54] {strides = array<i32: 1, 2, 1>} : memref<1x17x128xf32, #tpu.memory_space<vmem>>, vector<1x8x128xf32>
    %43 = arith.maximumf %41, %42 : vector<1x8x128xf32>
    %c0_55 = arith.constant 0 : index
    %c0_56 = arith.constant 0 : index
    %44 = vector.load %arg5[%c0_55, %c0_56] : memref<4x128xf32, #tpu.memory_space<vmem>>, vector<1x128xf32>
    %45 = vector.shape_cast %44 : vector<1x128xf32> to vector<128xf32>
    %cst_57 = arith.constant 0.000000e+00 : f32
    %46 = vector.broadcast %cst_57 : f32 to vector<1x8x128xf32>
    %47 = arith.maximumf %43, %46 : vector<1x8x128xf32>
    %c0_58 = arith.constant 0 : index
    %c1_59 = arith.constant 1 : index
    %c0_60 = arith.constant 0 : index
    %48 = vector.load %arg9[%c0_58, %c1_59, %c0_60] : memref<1x10x128xf32, #tpu.memory_space<vmem>>, vector<1x8x128xf32>
    tpu.vector_store %arg9[%c0_58, %c1_59, %c0_60], %47 {strides = array<i32>} : memref<1x10x128xf32, #tpu.memory_space<vmem>>, vector<1x8x128xf32>,
    %c0_61 = arith.constant 0 : index
    %c0_62 = arith.constant 0 : index
    %c0_63 = arith.constant 0 : index
    %49 = vector.load %arg9[%c0_61, %c0_62, %c0_63] : memref<1x10x128xf32, #tpu.memory_space<vmem>>, vector<1x8x128xf32>
    %50 = vector.shape_cast %49 : vector<1x8x128xf32> to vector<8x128xf32>
    %c0_64 = arith.constant 0 : index
    %c0_65 = arith.constant 0 : index
    %c0_66 = arith.constant 0 : index
    %c0_67 = arith.constant 0 : index
    %51 = vector.load %arg4[%c0_64, %c0_65, %c0_66, %c0_67] : memref<4x3x128x128xf32, #tpu.memory_space<vmem>>, vector<1x1x128x128xf32>
    %52 = vector.shape_cast %51 : vector<1x1x128x128xf32> to vector<128x128xf32>
    %cst_68 = arith.constant dense<0.000000e+00> : vector<8x128xf32>
    %53 = tpu.matmul %50, %52, %cst_68 {dimension_numbers = #tpu.dot_dimension_numbers<[1], [0], [0], [1], [0, 0, 1, 1], [], []>} : vector<8x128xf32>, vector<128x128xf32>, vector<8x128xf32> -> vector<8x128xf32>
    %c0_69 = arith.constant 0 : index
    %c1_70 = arith.constant 1 : index
    %c0_71 = arith.constant 0 : index
    %54 = vector.load %arg9[%c0_69, %c1_70, %c0_71] : memref<1x10x128xf32, #tpu.memory_space<vmem>>, vector<1x8x128xf32>
    %55 = vector.shape_cast %54 : vector<1x8x128xf32> to vector<8x128xf32>
    %c0_72 = arith.constant 0 : index
    %c1_73 = arith.constant 1 : index
    %c0_74 = arith.constant 0 : index
    %c0_75 = arith.constant 0 : index
    %56 = vector.load %arg4[%c0_72, %c1_73, %c0_74, %c0_75] : memref<4x3x128x128xf32, #tpu.memory_space<vmem>>, vector<1x1x128x128xf32>
    %57 = vector.shape_cast %56 : vector<1x1x128x128xf32> to vector<128x128xf32>
    %cst_76 = arith.constant dense<0.000000e+00> : vector<8x128xf32>
    %58 = tpu.matmul %55, %57, %cst_76 {dimension_numbers = #tpu.dot_dimension_numbers<[1], [0], [0], [1], [0, 0, 1, 1], [], []>} : vector<8x128xf32>, vector<128x128xf32>, vector<8x128xf32> -> vector<8x128xf32>
    %59 = arith.addf %53, %58 : vector<8x128xf32>
    %c0_77 = arith.constant 0 : index
    %c2_78 = arith.constant 2 : index
    %c0_79 = arith.constant 0 : index
    %60 = vector.load %arg9[%c0_77, %c2_78, %c0_79] : memref<1x10x128xf32, #tpu.memory_space<vmem>>, vector<1x8x128xf32>
    %61 = vector.shape_cast %60 : vector<1x8x128xf32> to vector<8x128xf32>
    %c0_80 = arith.constant 0 : index
    %c2_81 = arith.constant 2 : index
    %c0_82 = arith.constant 0 : index
    %c0_83 = arith.constant 0 : index
    %62 = vector.load %arg4[%c0_80, %c2_81, %c0_82, %c0_83] : memref<4x3x128x128xf32, #tpu.memory_space<vmem>>, vector<1x1x128x128xf32>
    %63 = vector.shape_cast %62 : vector<1x1x128x128xf32> to vector<128x128xf32>
    %cst_84 = arith.constant dense<0.000000e+00> : vector<8x128xf32>
    %64 = tpu.matmul %61, %63, %cst_84 {dimension_numbers = #tpu.dot_dimension_numbers<[1], [0], [0], [1], [0, 0, 1, 1], [], []>} : vector<8x128xf32>, vector<128x128xf32>, vector<8x128xf32> -> vector<8x128xf32>
    %65 = arith.addf %59, %64 : vector<8x128xf32>
    %66 = vector.shape_cast %45 : vector<128xf32> to vector<1x128xf32>
    %67 = vector.broadcast %66 : vector<1x128xf32> to vector<8x128xf32>
    %68 = arith.addf %65, %67 : vector<8x128xf32>
    %69 = vector.shape_cast %68 : vector<8x128xf32> to vector<1x8x128xf32>
    %c1_85 = arith.constant 1 : index
    %c0_86 = arith.constant 0 : index
    %70 = vector.load %arg5[%c1_85, %c0_86] : memref<4x128xf32, #tpu.memory_space<vmem>>, vector<1x128xf32>
    %71 = vector.shape_cast %70 : vector<1x128xf32> to vector<128xf32>
    %cst_87 = arith.constant 0.000000e+00 : f32
    %72 = vector.broadcast %cst_87 : f32 to vector<1x8x128xf32>
    %73 = arith.maximumf %69, %72 : vector<1x8x128xf32>
    %c0_88 = arith.constant 0 : index
    %c1_89 = arith.constant 1 : index
    %c0_90 = arith.constant 0 : index
    %74 = vector.load %arg9[%c0_88, %c1_89, %c0_90] : memref<1x10x128xf32, #tpu.memory_space<vmem>>, vector<1x8x128xf32>
    tpu.vector_store %arg9[%c0_88, %c1_89, %c0_90], %73 {strides = array<i32>} : memref<1x10x128xf32, #tpu.memory_space<vmem>>, vector<1x8x128xf32>,
    %c0_91 = arith.constant 0 : index
    %c0_92 = arith.constant 0 : index
    %c0_93 = arith.constant 0 : index
    %75 = vector.load %arg9[%c0_91, %c0_92, %c0_93] : memref<1x10x128xf32, #tpu.memory_space<vmem>>, vector<1x8x128xf32>
    %76 = vector.shape_cast %75 : vector<1x8x128xf32> to vector<8x128xf32>
    %c1_94 = arith.constant 1 : index
    %c0_95 = arith.constant 0 : index
    %c0_96 = arith.constant 0 : index
    %c0_97 = arith.constant 0 : index
    %77 = vector.load %arg4[%c1_94, %c0_95, %c0_96, %c0_97] : memref<4x3x128x128xf32, #tpu.memory_space<vmem>>, vector<1x1x128x128xf32>
    %78 = vector.shape_cast %77 : vector<1x1x128x128xf32> to vector<128x128xf32>
    %cst_98 = arith.constant dense<0.000000e+00> : vector<8x128xf32>
    %79 = tpu.matmul %76, %78, %cst_98 {dimension_numbers = #tpu.dot_dimension_numbers<[1], [0], [0], [1], [0, 0, 1, 1], [], []>} : vector<8x128xf32>, vector<128x128xf32>, vector<8x128xf32> -> vector<8x128xf32>
    %c0_99 = arith.constant 0 : index
    %c1_100 = arith.constant 1 : index
    %c0_101 = arith.constant 0 : index
    %80 = vector.load %arg9[%c0_99, %c1_100, %c0_101] : memref<1x10x128xf32, #tpu.memory_space<vmem>>, vector<1x8x128xf32>
    %81 = vector.shape_cast %80 : vector<1x8x128xf32> to vector<8x128xf32>
    %c1_102 = arith.constant 1 : index
    %c1_103 = arith.constant 1 : index
    %c0_104 = arith.constant 0 : index
    %c0_105 = arith.constant 0 : index
    %82 = vector.load %arg4[%c1_102, %c1_103, %c0_104, %c0_105] : memref<4x3x128x128xf32, #tpu.memory_space<vmem>>, vector<1x1x128x128xf32>
    %83 = vector.shape_cast %82 : vector<1x1x128x128xf32> to vector<128x128xf32>
    %cst_106 = arith.constant dense<0.000000e+00> : vector<8x128xf32>
    %84 = tpu.matmul %81, %83, %cst_106 {dimension_numbers = #tpu.dot_dimension_numbers<[1], [0], [0], [1], [0, 0, 1, 1], [], []>} : vector<8x128xf32>, vector<128x128xf32>, vector<8x128xf32> -> vector<8x128xf32>
    %85 = arith.addf %79, %84 : vector<8x128xf32>
    %c0_107 = arith.constant 0 : index
    %c2_108 = arith.constant 2 : index
    %c0_109 = arith.constant 0 : index
    %86 = vector.load %arg9[%c0_107, %c2_108, %c0_109] : memref<1x10x128xf32, #tpu.memory_space<vmem>>, vector<1x8x128xf32>
    %87 = vector.shape_cast %86 : vector<1x8x128xf32> to vector<8x128xf32>
    %c1_110 = arith.constant 1 : index
    %c2_111 = arith.constant 2 : index
    %c0_112 = arith.constant 0 : index
    %c0_113 = arith.constant 0 : index
    %88 = vector.load %arg4[%c1_110, %c2_111, %c0_112, %c0_113] : memref<4x3x128x128xf32, #tpu.memory_space<vmem>>, vector<1x1x128x128xf32>
    %89 = vector.shape_cast %88 : vector<1x1x128x128xf32> to vector<128x128xf32>
    %cst_114 = arith.constant dense<0.000000e+00> : vector<8x128xf32>
    %90 = tpu.matmul %87, %89, %cst_114 {dimension_numbers = #tpu.dot_dimension_numbers<[1], [0], [0], [1], [0, 0, 1, 1], [], []>} : vector<8x128xf32>, vector<128x128xf32>, vector<8x128xf32> -> vector<8x128xf32>
    %91 = arith.addf %85, %90 : vector<8x128xf32>
    %92 = vector.shape_cast %71 : vector<128xf32> to vector<1x128xf32>
    %93 = vector.broadcast %92 : vector<1x128xf32> to vector<8x128xf32>
    %94 = arith.addf %91, %93 : vector<8x128xf32>
    %95 = vector.shape_cast %94 : vector<8x128xf32> to vector<1x8x128xf32>
    %96 = arith.addf %95, %43 : vector<1x8x128xf32>
    %c2_115 = arith.constant 2 : index
    %c0_116 = arith.constant 0 : index
    %97 = vector.load %arg5[%c2_115, %c0_116] : memref<4x128xf32, #tpu.memory_space<vmem>>, vector<1x128xf32>
    %98 = vector.shape_cast %97 : vector<1x128xf32> to vector<128xf32>
    %cst_117 = arith.constant 0.000000e+00 : f32
    %99 = vector.broadcast %cst_117 : f32 to vector<1x8x128xf32>
    %100 = arith.maximumf %96, %99 : vector<1x8x128xf32>
    %c0_118 = arith.constant 0 : index
    %c1_119 = arith.constant 1 : index
    %c0_120 = arith.constant 0 : index
    %101 = vector.load %arg9[%c0_118, %c1_119, %c0_120] : memref<1x10x128xf32, #tpu.memory_space<vmem>>, vector<1x8x128xf32>
    tpu.vector_store %arg9[%c0_118, %c1_119, %c0_120], %100 {strides = array<i32>} : memref<1x10x128xf32, #tpu.memory_space<vmem>>, vector<1x8x128xf32>,
    %c0_121 = arith.constant 0 : index
    %c0_122 = arith.constant 0 : index
    %c0_123 = arith.constant 0 : index
    %102 = vector.load %arg9[%c0_121, %c0_122, %c0_123] : memref<1x10x128xf32, #tpu.memory_space<vmem>>, vector<1x8x128xf32>
    %103 = vector.shape_cast %102 : vector<1x8x128xf32> to vector<8x128xf32>
    %c2_124 = arith.constant 2 : index
    %c0_125 = arith.constant 0 : index
    %c0_126 = arith.constant 0 : index
    %c0_127 = arith.constant 0 : index
    %104 = vector.load %arg4[%c2_124, %c0_125, %c0_126, %c0_127] : memref<4x3x128x128xf32, #tpu.memory_space<vmem>>, vector<1x1x128x128xf32>
    %105 = vector.shape_cast %104 : vector<1x1x128x128xf32> to vector<128x128xf32>
    %cst_128 = arith.constant dense<0.000000e+00> : vector<8x128xf32>
    %106 = tpu.matmul %103, %105, %cst_128 {dimension_numbers = #tpu.dot_dimension_numbers<[1], [0], [0], [1], [0, 0, 1, 1], [], []>} : vector<8x128xf32>, vector<128x128xf32>, vector<8x128xf32> -> vector<8x128xf32>
    %c0_129 = arith.constant 0 : index
    %c1_130 = arith.constant 1 : index
    %c0_131 = arith.constant 0 : index
    %107 = vector.load %arg9[%c0_129, %c1_130, %c0_131] : memref<1x10x128xf32, #tpu.memory_space<vmem>>, vector<1x8x128xf32>
    %108 = vector.shape_cast %107 : vector<1x8x128xf32> to vector<8x128xf32>
    %c2_132 = arith.constant 2 : index
    %c1_133 = arith.constant 1 : index
    %c0_134 = arith.constant 0 : index
    %c0_135 = arith.constant 0 : index
    %109 = vector.load %arg4[%c2_132, %c1_133, %c0_134, %c0_135] : memref<4x3x128x128xf32, #tpu.memory_space<vmem>>, vector<1x1x128x128xf32>
    %110 = vector.shape_cast %109 : vector<1x1x128x128xf32> to vector<128x128xf32>
    %cst_136 = arith.constant dense<0.000000e+00> : vector<8x128xf32>
    %111 = tpu.matmul %108, %110, %cst_136 {dimension_numbers = #tpu.dot_dimension_numbers<[1], [0], [0], [1], [0, 0, 1, 1], [], []>} : vector<8x128xf32>, vector<128x128xf32>, vector<8x128xf32> -> vector<8x128xf32>
    %112 = arith.addf %106, %111 : vector<8x128xf32>
    %c0_137 = arith.constant 0 : index
    %c2_138 = arith.constant 2 : index
    %c0_139 = arith.constant 0 : index
    %113 = vector.load %arg9[%c0_137, %c2_138, %c0_139] : memref<1x10x128xf32, #tpu.memory_space<vmem>>, vector<1x8x128xf32>
    %114 = vector.shape_cast %113 : vector<1x8x128xf32> to vector<8x128xf32>
    %c2_140 = arith.constant 2 : index
    %c2_141 = arith.constant 2 : index
    %c0_142 = arith.constant 0 : index
    %c0_143 = arith.constant 0 : index
    %115 = vector.load %arg4[%c2_140, %c2_141, %c0_142, %c0_143] : memref<4x3x128x128xf32, #tpu.memory_space<vmem>>, vector<1x1x128x128xf32>
    %116 = vector.shape_cast %115 : vector<1x1x128x128xf32> to vector<128x128xf32>
    %cst_144 = arith.constant dense<0.000000e+00> : vector<8x128xf32>
    %117 = tpu.matmul %114, %116, %cst_144 {dimension_numbers = #tpu.dot_dimension_numbers<[1], [0], [0], [1], [0, 0, 1, 1], [], []>} : vector<8x128xf32>, vector<128x128xf32>, vector<8x128xf32> -> vector<8x128xf32>
    %118 = arith.addf %112, %117 : vector<8x128xf32>
    %119 = vector.shape_cast %98 : vector<128xf32> to vector<1x128xf32>
    %120 = vector.broadcast %119 : vector<1x128xf32> to vector<8x128xf32>
    %121 = arith.addf %118, %120 : vector<8x128xf32>
    %122 = vector.shape_cast %121 : vector<8x128xf32> to vector<1x8x128xf32>
    %c3 = arith.constant 3 : index
    %c0_145 = arith.constant 0 : index
    %123 = vector.load %arg5[%c3, %c0_145] : memref<4x128xf32, #tpu.memory_space<vmem>>, vector<1x128xf32>
    %124 = vector.shape_cast %123 : vector<1x128xf32> to vector<128xf32>
    %cst_146 = arith.constant 0.000000e+00 : f32
    %125 = vector.broadcast %cst_146 : f32 to vector<1x8x128xf32>
    %126 = arith.maximumf %122, %125 : vector<1x8x128xf32>
    %c0_147 = arith.constant 0 : index
    %c1_148 = arith.constant 1 : index
    %c0_149 = arith.constant 0 : index
    %127 = vector.load %arg9[%c0_147, %c1_148, %c0_149] : memref<1x10x128xf32, #tpu.memory_space<vmem>>, vector<1x8x128xf32>
    tpu.vector_store %arg9[%c0_147, %c1_148, %c0_149], %126 {strides = array<i32>} : memref<1x10x128xf32, #tpu.memory_space<vmem>>, vector<1x8x128xf32>,
    %c0_150 = arith.constant 0 : index
    %c0_151 = arith.constant 0 : index
    %c0_152 = arith.constant 0 : index
    %128 = vector.load %arg9[%c0_150, %c0_151, %c0_152] : memref<1x10x128xf32, #tpu.memory_space<vmem>>, vector<1x8x128xf32>
    %129 = vector.shape_cast %128 : vector<1x8x128xf32> to vector<8x128xf32>
    %c3_153 = arith.constant 3 : index
    %c0_154 = arith.constant 0 : index
    %c0_155 = arith.constant 0 : index
    %c0_156 = arith.constant 0 : index
    %130 = vector.load %arg4[%c3_153, %c0_154, %c0_155, %c0_156] : memref<4x3x128x128xf32, #tpu.memory_space<vmem>>, vector<1x1x128x128xf32>
    %131 = vector.shape_cast %130 : vector<1x1x128x128xf32> to vector<128x128xf32>
    %cst_157 = arith.constant dense<0.000000e+00> : vector<8x128xf32>
    %132 = tpu.matmul %129, %131, %cst_157 {dimension_numbers = #tpu.dot_dimension_numbers<[1], [0], [0], [1], [0, 0, 1, 1], [], []>} : vector<8x128xf32>, vector<128x128xf32>, vector<8x128xf32> -> vector<8x128xf32>
    %c0_158 = arith.constant 0 : index
    %c1_159 = arith.constant 1 : index
    %c0_160 = arith.constant 0 : index
    %133 = vector.load %arg9[%c0_158, %c1_159, %c0_160] : memref<1x10x128xf32, #tpu.memory_space<vmem>>, vector<1x8x128xf32>
    %134 = vector.shape_cast %133 : vector<1x8x128xf32> to vector<8x128xf32>
    %c3_161 = arith.constant 3 : index
    %c1_162 = arith.constant 1 : index
    %c0_163 = arith.constant 0 : index
    %c0_164 = arith.constant 0 : index
    %135 = vector.load %arg4[%c3_161, %c1_162, %c0_163, %c0_164] : memref<4x3x128x128xf32, #tpu.memory_space<vmem>>, vector<1x1x128x128xf32>
    %136 = vector.shape_cast %135 : vector<1x1x128x128xf32> to vector<128x128xf32>
    %cst_165 = arith.constant dense<0.000000e+00> : vector<8x128xf32>
    %137 = tpu.matmul %134, %136, %cst_165 {dimension_numbers = #tpu.dot_dimension_numbers<[1], [0], [0], [1], [0, 0, 1, 1], [], []>} : vector<8x128xf32>, vector<128x128xf32>, vector<8x128xf32> -> vector<8x128xf32>
    %138 = arith.addf %132, %137 : vector<8x128xf32>
    %c0_166 = arith.constant 0 : index
    %c2_167 = arith.constant 2 : index
    %c0_168 = arith.constant 0 : index
    %139 = vector.load %arg9[%c0_166, %c2_167, %c0_168] : memref<1x10x128xf32, #tpu.memory_space<vmem>>, vector<1x8x128xf32>
    %140 = vector.shape_cast %139 : vector<1x8x128xf32> to vector<8x128xf32>
    %c3_169 = arith.constant 3 : index
    %c2_170 = arith.constant 2 : index
    %c0_171 = arith.constant 0 : index
    %c0_172 = arith.constant 0 : index
    %141 = vector.load %arg4[%c3_169, %c2_170, %c0_171, %c0_172] : memref<4x3x128x128xf32, #tpu.memory_space<vmem>>, vector<1x1x128x128xf32>
    %142 = vector.shape_cast %141 : vector<1x1x128x128xf32> to vector<128x128xf32>
    %cst_173 = arith.constant dense<0.000000e+00> : vector<8x128xf32>
    %143 = tpu.matmul %140, %142, %cst_173 {dimension_numbers = #tpu.dot_dimension_numbers<[1], [0], [0], [1], [0, 0, 1, 1], [], []>} : vector<8x128xf32>, vector<128x128xf32>, vector<8x128xf32> -> vector<8x128xf32>
    %144 = arith.addf %138, %143 : vector<8x128xf32>
    %145 = vector.shape_cast %124 : vector<128xf32> to vector<1x128xf32>
    %146 = vector.broadcast %145 : vector<1x128xf32> to vector<8x128xf32>
    %147 = arith.addf %144, %146 : vector<8x128xf32>
    %148 = vector.shape_cast %147 : vector<8x128xf32> to vector<1x8x128xf32>
    %149 = arith.addf %148, %96 : vector<1x8x128xf32>
    %c0_174 = arith.constant 0 : index
    %c0_175 = arith.constant 0 : index
    %c0_176 = arith.constant 0 : index
    %150 = vector.load %arg6[%c0_174, %c0_175, %c0_176] : memref<1x8x128xf32, #tpu.memory_space<vmem>>, vector<1x8x128xf32>
    tpu.vector_store %arg6[%c0_174, %c0_175, %c0_176], %149 {strides = array<i32>} : memref<1x8x128xf32, #tpu.memory_space<vmem>>, vector<1x8x128xf32>,
    return
  }
  func.func @transform_0(%arg0: i32) -> (i32, i32, i32) {
    %c0_i32 = arith.constant 0 : i32
    %c0_i32_0 = arith.constant 0 : i32
    %c0_i32_1 = arith.constant 0 : i32
    return %arg0, %c0_i32, %c0_i32_0 : i32, i32, i32
  }
  func.func @transform_1(%arg0: i32) -> (i32, i32, i32) {
    %c0_i32 = arith.constant 0 : i32
    %c0_i32_0 = arith.constant 0 : i32
    %c0_i32_1 = arith.constant 0 : i32
    %c0_i32_2 = arith.constant 0 : i32
    return %c0_i32, %c0_i32_0, %c0_i32_1 : i32, i32, i32
  }
  func.func @transform_2(%arg0: i32) -> (i32, i32) {
    %c0_i32 = arith.constant 0 : i32
    %c0_i32_0 = arith.constant 0 : i32
    %c0_i32_1 = arith.constant 0 : i32
    return %c0_i32, %c0_i32_0 : i32, i32
  }
  func.func @transform_3(%arg0: i32) -> (i32, i32, i32, i32) {
    %c0_i32 = arith.constant 0 : i32
    %c0_i32_0 = arith.constant 0 : i32
    %c0_i32_1 = arith.constant 0 : i32
    %c0_i32_2 = arith.constant 0 : i32
    %c0_i32_3 = arith.constant 0 : i32
    return %c0_i32, %c0_i32_0, %c0_i32_1, %c0_i32_2 : i32, i32, i32, i32
  }
  func.func @transform_4(%arg0: i32) -> (i32, i32) {
    %c0_i32 = arith.constant 0 : i32
    %c0_i32_0 = arith.constant 0 : i32
    %c0_i32_1 = arith.constant 0 : i32
    return %c0_i32, %c0_i32_0 : i32, i32
  }
  func.func @transform_5(%arg0: i32) -> (i32, i32, i32) {
    %c0_i32 = arith.constant 0 : i32
    %c0_i32_0 = arith.constant 0 : i32
    %c0_i32_1 = arith.constant 0 : i32
    return %arg0, %c0_i32, %c0_i32_0 : i32, i32, i32
  }
}

</mosaic_0001>

<bundles_post_ra>
// kernel: conv_sequence_forward.1
= control target key start
LH: loop header
LB: loop body
LE: loop exit
PB: predicated region body
PF: predicated region fallthrough
CT: control target
= control target key end

     0   :  { %s3389_s18 = smov 0   ;;  %s4375_s0 = inlined_call_operand.vmem [shape: f32[2,16,64], index: 0, kind: input, shape index: {}]   ;;  %s4376_s1 = inlined_call_operand.vmem [shape: f32[3,64,384], index: 1, kind: input, shape index: {}]   ;;  %s4377_s2 = inlined_call_operand.vmem [shape: f32[1,384], index: 2, kind: input, shape index: {}]   ;;  %s4378_s3 = inlined_call_operand.vmem [shape: f32[4,3,128,128], index: 3, kind: input, shape index: {}]   ;;  %s4379_s4 = inlined_call_operand.vmem [shape: f32[4,128], index: 4, kind: input, shape index: {}]   ;;  %s4380_s5 = inlined_call_operand.vmem [shape: f32[2,8,128], index: 5, kind: output, shape index: {}]  }
   0x1 LB: > { %s1977_s19 = sadd.s32 4294967295, %s3353_s18   ;;  %p1981_p0 = scmp.ge.s32.totalorder %s3353_s18, 1  ;;  %s3353_s18 = sphi %s3389_s18, %s15_s18  }
   0x2   : > { %p187_p1 = scmp.lt.s32.totalorder %s3353_s18, 3 }
   0x4   : > { %p188_p2 = pnand %p1981_p0, %p187_p1 }
   0x5   : > { %v1986_v0 = vld [vmem:[%s4376_s1 + $0xc8] sm:$0xff] (!%p188_p2)  ;;  %v1989_v1 = vld [vmem:[%s4376_s1 + $0xe0] sm:$0xff] (!%p188_p2)  ;;  %v1987_v2 = vld [vmem:[%s4376_s1 + $0xd0] sm:$0xff] (!%p188_p2)  ;;  %p3406_p3 = scmp.lt.s32.totalorder (!%p188_p2), %s1977_s19, 1  ;;  %v3355_v7 = vmov (!%p188_p2), 0.0   ;;  %vm223_vm0 = vcmask (!%p188_p2), 516096  }
   0x6   : > { %191 = sbr.rel (%p188_p2) target bundleno = 1297 (0x511), region = 40  ;;  %v2939_v3 = vpack.c.bf16 (!%p188_p2), %v1989_v1, %v1986_v0  ;;  %v1990_v4 = vld [vmem:[%s4376_s1 + $0xe8] sm:$0xff] (!%p188_p2)  ;;  %v1985_v5 = vld [vmem:[%s4376_s1 + $0xc0] sm:$0xff] (!%p188_p2)  ;;  %v1988_v6 = vld [vmem:[%s4376_s1 + $0xd8] sm:$0xff] (!%p188_p2)  ;;  %358 = vmatprep.mubr.f32.mxu0 (!%p188_p2), %v3355_v7  ;;  %226 = vst [vmem:[#allocation4] sm:$0x1] (!%p188_p2), %v3355_v7 }
   0x7   : > { %227 = vst [vmem:[#allocation4 + $0x9] sm:$0x1] (!%p188_p2), %v3355_v7  ;;  %v2955_v8 = vpack.c.bf16 (!%p188_p2), %v1990_v4, %v1987_v2  ;;  %v2941_v9 = vpack.c.bf16 (!%p188_p2), %v1988_v6, %v1985_v5  ;;  %v1992_v10 = vld [vmem:[%s4376_s1 + $0xf8] sm:$0xff] (!%p188_p2)  ;;  %v1995_v11 = vld [vmem:[%s4376_s1 + $0x110] sm:$0xff] (!%p188_p2)  ;;  %v1993_v12 = vld [vmem:[%s4376_s1 + $0x100] sm:$0xff] (!%p188_p2)  ;;  %vm232_vm1 = vcmask (!%p188_p2), 523264  }
   0x8   : > { %224 = vst.msk [vmem:[#allocation2] sm:$0x1] (!%p188_p2), %vm223_vm0, %v3355_v7  ;;  %225 = vst.msk [vmem:[#allocation2 + $0x11] sm:$0x1] (!%p188_p2), %vm223_vm0, %v3355_v7  ;;  %2940 = vmatprep.subr.bf16.mxu0 (!%p188_p2), %v2939_v3  ;;  %v2943_v13 = vpack.c.bf16 (!%p188_p2), %v1995_v11, %v1992_v10  ;;  %v1996_v14 = vld [vmem:[%s4376_s1 + $0x118] sm:$0xff] (!%p188_p2)  ;;  %v1991_v15 = vld [vmem:[%s4376_s1 + $0xf0] sm:$0xff] (!%p188_p2) }
   0x9   : > { %v1994_v16 = vld [vmem:[%s4376_s1 + $0x108] sm:$0xff] (!%p188_p2)  ;;  %2956 = vmatprep.subr.bf16.mxu1 (!%p188_p2), %v2955_v8  ;;  %2942 = vmatpush1.bf16.msra.mxu0 (!%p188_p2), %v2941_v9  ;;  %v2959_v17 = vpack.c.bf16 (!%p188_p2), %v1996_v14, %v1993_v12  ;;  %v2001_v20 = vld [vmem:[%s4376_s1 + $0x140] sm:$0xff] (!%p188_p2)  ;;  %v1999_v21 = vld [vmem:[%s4376_s1 + $0x130] sm:$0xff] (!%p188_p2)  ;;  %vm3358_vm2 = vmmov (!%p188_p2), 0  }
   0xa   : > { %v2945_v18 = vpack.c.bf16 (!%p188_p2), %v1994_v16, %v1991_v15  ;;  %v1998_v19 = vld [vmem:[%s4376_s1 + $0x128] sm:$0xff] (!%p188_p2)  ;;  %2958 = vmatpush3.bf16.msra.mxu1 (!%p188_p2), %v2955_v8  ;;  %2944 = vmatprep.subr.bf16.mxu0 (!%p188_p2), %v2943_v13  ;;  %v1997_v24 = vld [vmem:[%s4376_s1 + $0x120] sm:$0xff] (!%p188_p2)  ;;  %v2000_v25 = vld [vmem:[%s4376_s1 + $0x138] sm:$0xff] (!%p188_p2) }
   0xb   : > { %v2947_v22 = vpack.c.bf16 (!%p188_p2), %v2001_v20, %v1998_v19  ;;  %v2002_v23 = vld [vmem:[%s4376_s1 + $0x148] sm:$0xff] (!%p188_p2)  ;;  %2960 = vmatprep.subr.bf16.mxu1 (!%p188_p2), %v2959_v17  ;;  %v2004_v27 = vld [vmem:[%s4376_s1 + $0x158] sm:$0xff] (!%p188_p2)  ;;  %v2007_v28 = vld [vmem:[%s4376_s1 + $0x170] sm:$0xff] (!%p188_p2)  ;;  %v2949_v31 = vpack.c.bf16 (!%p188_p2), %v2000_v25, %v1997_v24 }
   0xc   : > { %v2963_v26 = vpack.c.bf16 (!%p188_p2), %v2002_v23, %v1999_v21  ;;  %v2005_v29 = vld [vmem:[%s4376_s1 + $0x160] sm:$0xff] (!%p188_p2)  ;;  %v2008_v30 = vld [vmem:[%s4376_s1 + $0x178] sm:$0xff] (!%p188_p2)  ;;  %v2951_v34 = vpack.c.bf16 (!%p188_p2), %v2007_v28, %v2004_v27  ;;  %v2003_v35 = vld [vmem:[%s4376_s1 + $0x150] sm:$0xff] (!%p188_p2) }
   0xd   : > { %s4383_s19 = smov (!%p3406_p3, %s1977_s19), 1  ;;  %2946 = vmatpush1.bf16.msra.mxu0 %v2945_v18  ;;  %v2006_v36 = vld [vmem:[%s4376_s1 + $0x168] sm:$0xff]  ;;  %v2967_v37 = vpack.c.bf16 %v2008_v30, %v2005_v29  ;;  %v241_v39 = vld [vmem:[%s4376_s1 + $0x20] sm:$0xff]  ;;  %v239_v40 = vld [vmem:[%s4376_s1 + $0x10] sm:$0xff] }
   0xe   : > { %s2227_s28 = sshll.u32 %s4383_s19, 4  ;;  %2962 = vmatpush3.bf16.msra.mxu1 %v2959_v17  ;;  %2948 = vmatprep.subr.bf16.mxu0 %v2947_v22  ;;  %v238_v38 = vld [vmem:[%s4376_s1 + $0x8] sm:$0xff]  ;;  %v2953_v42 = vpack.c.bf16 %v2006_v36, %v2003_v35  ;;  %v237_v43 = vld [vmem:[%s4376_s1] sm:$0xff]  ;;  %v240_v44 = vld [vmem:[%s4376_s1 + $0x18] sm:$0xff]  ;;  %s1984_s9 = sshll.u32 %s4383_s19, 3 }
   0xf   : > { %s218_s12 = scalar_lea.vmem %s4375_s0, %s2227_s28  ;;  %2964 = vmatprep.subr.bf16.mxu1 %v2963_v26  ;;  %v242_v41 = vld [vmem:[%s4376_s1 + $0x28] sm:$0xff]  ;;  %v2971_v45 = vpack.c.bf16 %v241_v39, %v238_v38  ;;  %v244_v47 = vld [vmem:[%s4376_s1 + $0x38] sm:$0xff]  ;;  %v247_v48 = vld [vmem:[%s4376_s1 + $0x50] sm:$0xff]  ;;  %v2973_v52 = vpack.c.bf16 %v240_v44, %v237_v43 }
  0x10   : > { %v229_v32 = vld [vmem:[%s218_s12] sm:$0xff]  ;;  %v230_v33 = vld [vmem:[%s218_s12 + $0x8] sm:$0xff]  ;;  %v2987_v46 = vpack.c.bf16 %v242_v41, %v239_v40  ;;  %v248_v50 = vld [vmem:[%s4376_s1 + $0x58] sm:$0xff]  ;;  %v2975_v54 = vpack.c.bf16 %v247_v48, %v244_v47  ;;  %s222_s12 = scalar_lea.vmem %s4380_s5, %s1984_s9 }
  0x11   : > { %233 = vst.msk [vmem:[#allocation2 + $0x1] sm:$0xff] %vm232_vm1, %v229_v32  ;;  %234 = vst.msk [vmem:[#allocation2 + $0x9] sm:$0xff] %vm232_vm1, %v230_v33  ;;  %2950 = vmatpush1.bf16.msra.mxu0 %v2949_v31  ;;  %v245_v49 = vld [vmem:[%s4376_s1 + $0x40] sm:$0xff]  ;;  %v243_v55 = vld [vmem:[%s4376_s1 + $0x30] sm:$0xff] }
  0x12   : > { %2966 = vmatpush3.bf16.msra.mxu1 %v2963_v26  ;;  %2952 = vmatprep.subr.bf16.mxu0 %v2951_v34  ;;  %v246_v56 = vld [vmem:[%s4376_s1 + $0x48] sm:$0xff]  ;;  %v2991_v57 = vpack.c.bf16 %v248_v50, %v245_v49  ;;  %v253_v59 = vld [vmem:[%s4376_s1 + $0x80] sm:$0xff]  ;;  %v251_v60 = vld [vmem:[%s4376_s1 + $0x70] sm:$0xff] }
  0x13   : > { %2968 = vmatprep.subr.bf16.mxu1 %v2967_v37  ;;  %v250_v58 = vld [vmem:[%s4376_s1 + $0x68] sm:$0xff]  ;;  %v2977_v62 = vpack.c.bf16 %v246_v56, %v243_v55  ;;  %v249_v1 = vld [vmem:[%s4376_s1 + $0x60] sm:$0xff]  ;;  %v252_v2 = vld [vmem:[%s4376_s1 + $0x78] sm:$0xff] }
  0x14   : > { %v254_v61 = vld [vmem:[%s4376_s1 + $0x88] sm:$0xff]  ;;  %v2979_v0 = vpack.c.bf16 %v253_v59, %v250_v58  ;;  %v256_v4 = vld [vmem:[%s4376_s1 + $0x98] sm:$0xff]  ;;  %v259_v5 = vld [vmem:[%s4376_s1 + $0xb0] sm:$0xff]  ;;  %v2981_v9 = vpack.c.bf16 %v252_v2, %v249_v1 }
  0x15   : > { %2954 = vmatpush1.bf16.msra.mxu0 %v2953_v42  ;;  %v2995_v3 = vpack.c.bf16 %v254_v61, %v251_v60  ;;  %v257_v6 = vld [vmem:[%s4376_s1 + $0xa0] sm:$0xff]  ;;  %v260_v8 = vld [vmem:[%s4376_s1 + $0xb8] sm:$0xff]  ;;  %v2983_v10 = vpack.c.bf16 %v259_v5, %v256_v4  ;;  %v255_v11 = vld [vmem:[%s4376_s1 + $0x90] sm:$0xff] }
  0x16   : > { %2970 = vmatpush3.bf16.msra.mxu1 %v2967_v37  ;;  %2972 = vmatprep.subr.bf16.mxu0 %v2971_v45  ;;  %v258_v12 = vld [vmem:[%s4376_s1 + $0xa8] sm:$0xff]  ;;  %v2999_v13 = vpack.c.bf16 %v260_v8, %v257_v6  ;;  %v2021_v15 = vld [vmem:[%s4376_s1 + $0x1a0] sm:$0xff]  ;;  %v2019_v16 = vld [vmem:[%s4376_s1 + $0x190] sm:$0xff] }
  0x17   : > { %2988 = vmatprep.subr.bf16.mxu1 %v2987_v46  ;;  %v2018_v14 = vld [vmem:[%s4376_s1 + $0x188] sm:$0xff]  ;;  %v2985_v18 = vpack.c.bf16 %v258_v12, %v255_v11  ;;  %v2017_v20 = vld [vmem:[%s4376_s1 + $0x180] sm:$0xff]  ;;  %v2020_v21 = vld [vmem:[%s4376_s1 + $0x198] sm:$0xff]  ;;  %v3357_v12 = vmov -1e+30  }
  0x18   : > { %v261_v51 = vld [vmem:[#allocation2 + $0x1] sm:$0xff]  ;;  %v262_v53 = vld [vmem:[#allocation2 + $0x9] sm:$0xff]  ;;  %v3003_v19 = vpack.c.bf16 %v2021_v15, %v2018_v14  ;;  %v2024_v23 = vld [vmem:[%s4376_s1 + $0x1b8] sm:$0xff]  ;;  %v3005_v27 = vpack.c.bf16 %v2020_v21, %v2017_v20  ;;  %228 = vst [vmem:[#allocation3] sm:$0x1] %v3357_v12 }
  0x19   : > { %2478 = vmatprep.mubr.msk.f32.mxu1 %vm232_vm1, %v261_v51  ;;  %2009 = vmatmul.mubr.msk.f32.vlgmr.msra.gmra.mrb[0].mxu0 %vm232_vm1, %v261_v51  ;;  %v235_v63 = vld [vmem:[#allocation2] sm:$0xff]  ;;  %v2022_v17 = vld [vmem:[%s4376_s1 + $0x1a8] sm:$0xff]  ;;  %v2027_v24 = vld [vmem:[%s4376_s1 + $0x1d0] sm:$0xff] }
  0x1a   : > { %2479 = vmatmul.mubr.msk.f32.vlgmr.msra.gmra.mrb[0].mxu1 %vm232_vm1, %v262_v53  ;;  %2974 = vmatpush1.bf16.msra.mxu0 %v2973_v52  ;;  %v3019_v22 = vpack.c.bf16 %v2022_v17, %v2019_v16  ;;  %v2025_v25 = vld [vmem:[%s4376_s1 + $0x1c0] sm:$0xff]  ;;  %v2028_v26 = vld [vmem:[%s4376_s1 + $0x1d8] sm:$0xff]  ;;  %v236_v28 = vld [vmem:[#allocation2 + $0x8] sm:$0xff]  ;;  %v3007_v29 = vpack.c.bf16 %v2027_v24, %v2024_v23 }
  0x1b   : > { %2990 = vmatpush3.bf16.msra.mxu1 %v2987_v46  ;;  %2976 = vmatprep.subr.bf16.mxu0 %v2975_v54  ;;  %v2023_v30 = vld [vmem:[%s4376_s1 + $0x1b0] sm:$0xff]  ;;  %v2026_v31 = vld [vmem:[%s4376_s1 + $0x1c8] sm:$0xff]  ;;  %v3023_v32 = vpack.c.bf16 %v2028_v26, %v2025_v25  ;;  %v2033_v34 = vld [vmem:[%s4376_s1 + $0x200] sm:$0xff] }
  0x1c   : > { %2992 = vmatprep.subr.bf16.mxu1 %v2991_v57  ;;  %364 = vmatprep.mubr.f32.mxu0 %v3355_v7  ;;  %v2030_v33 = vld [vmem:[%s4376_s1 + $0x1e8] sm:$0xff]  ;;  %v2031_v35 = vld [vmem:[%s4376_s1 + $0x1f0] sm:$0xff]  ;;  %v3009_v37 = vpack.c.bf16 %v2026_v31, %v2023_v30  ;;  %v2029_v40 = vld [vmem:[%s4376_s1 + $0x1e0] sm:$0xff] }
  0x1d   : > { %2010 = vmatmul.mubr.msk.f32.gmra.mrb[2].mxu0 %vm232_vm1, %v262_v53  ;;  %2497 = vmatprep.mubr.msk.f32.mxu1 %vm232_vm1, %v235_v63  ;;  %v2034_v36 = vld [vmem:[%s4376_s1 + $0x208] sm:$0xff]  ;;  %v3011_v39 = vpack.c.bf16 %v2033_v34, %v2030_v33  ;;  %v2032_v41 = vld [vmem:[%s4376_s1 + $0x1f8] sm:$0xff]  ;;  %v2039_v44 = vld [vmem:[%s4376_s1 + $0x230] sm:$0xff] }
  0x1e   : > { %2978 = vmatpush1.bf16.msra.mxu0 %v2977_v62  ;;  %516 = vmatprep.mubr.f32.mxu0 %v3355_v7  ;;  %v604_v38 = vld [vmem:[#allocation2 + $0x2] sm:$0xff]  ;;  %v3027_v42 = vpack.c.bf16 %v2034_v36, %v2031_v35  ;;  %v2036_v43 = vld [vmem:[%s4376_s1 + $0x218] sm:$0xff]  ;;  %v3013_v47 = vpack.c.bf16 %v2032_v41, %v2029_v40  ;;  %v2035_v49 = vld [vmem:[%s4376_s1 + $0x210] sm:$0xff]  ;;  %v796_v41 = vlaneseq }
  0x1f   : > { %2994 = vmatpush3.bf16.msra.mxu1 %v2991_v57  ;;  %2980 = vmatprep.subr.bf16.mxu0 %v2979_v0  ;;  %v2037_v45 = vld [vmem:[%s4376_s1 + $0x220] sm:$0xff]  ;;  %v2040_v46 = vld [vmem:[%s4376_s1 + $0x238] sm:$0xff]  ;;  %v3015_v48 = vpack.c.bf16 %v2039_v44, %v2036_v43  ;;  %v2038_v50 = vld [vmem:[%s4376_s1 + $0x228] sm:$0xff]  ;;  %v3356_v57 = vmov 0.0|0.0  }
  0x20   : > { %2996 = vmatprep.subr.bf16.mxu1 %v2995_v3  ;;  %v3031_v51 = vpack.c.bf16 %v2040_v46, %v2037_v45  ;;  %v3017_v52 = vpack.c.bf16 %v2038_v50, %v2035_v49  ;;  %v605_v53 = vld [vmem:[#allocation2 + $0xa] sm:$0xff]  ;;  %v2045_v54 = vld [vmem:[%s4378_s3 + $0x80] sm:$0xff]  ;;  %v2048_v59 = vld [vmem:[%s4378_s3 + $0x98] sm:$0xff] }
  0x21   : > { %v2046_v55 = vld [vmem:[%s4378_s3 + $0x88] sm:$0xff]  ;;  %v2047_v58 = vld [vmem:[%s4378_s3 + $0x90] sm:$0xff]  ;;  %v2049_v61 = vld [vmem:[%s4378_s3 + $0xa0] sm:$0xff] }
  0x22   : > { %2982 = vmatpush1.bf16.msra.mxu0 %v2981_v9  ;;  %v3036_v56 = vpack.c.bf16 %v2046_v55, %v2045_v54  ;;  %v3039_v60 = vpack.c.bf16 %v2048_v59, %v2047_v58  ;;  %v2050_v62 = vld [vmem:[%s4378_s3 + $0xa8] sm:$0xff]  ;;  %v2052_v4 = vld [vmem:[%s4378_s3 + $0xb8] sm:$0xff]  ;;  %v836_v5 = vld [vmem:[%s4378_s3 + $0x10] sm:$0xff] }
  0x23   : > { %2998 = vmatpush3.bf16.msra.mxu1 %v2995_v3  ;;  %2984 = vmatprep.subr.bf16.mxu0 %v2983_v10  ;;  %v835_v0 = vld [vmem:[%s4378_s3 + $0x8] sm:$0xff]  ;;  %v3042_v1 = vpack.c.bf16 %v2050_v62, %v2049_v61  ;;  %v2051_v3 = vld [vmem:[%s4378_s3 + $0xb0] sm:$0xff]  ;;  %v837_v6 = vld [vmem:[%s4378_s3 + $0x18] sm:$0xff] }
  0x24   : > { %3000 = vmatprep.subr.bf16.mxu1 %v2999_v13  ;;  %v3045_v8 = vpack.c.bf16 %v2052_v4, %v2051_v3  ;;  %v3063_v9 = vpack.c.bf16 %v837_v6, %v836_v5  ;;  %v2053_v10 = vld [vmem:[%s4378_s3 + $0xc0] sm:$0xff]  ;;  %v2054_v11 = vld [vmem:[%s4378_s3 + $0xc8] sm:$0xff]  ;;  %v2055_v17 = vld [vmem:[%s4378_s3 + $0xd0] sm:$0xff] }
  0x25   : > { %v839_v14 = vld [vmem:[%s4378_s3 + $0x28] sm:$0xff]  ;;  %v3048_v15 = vpack.c.bf16 %v2054_v11, %v2053_v10  ;;  %v841_v20 = vld [vmem:[%s4378_s3 + $0x38] sm:$0xff]  ;;  %v2057_v23 = vld [vmem:[%s4378_s3 + $0xe0] sm:$0xff] }
  0x26   : > { %2986 = vmatpush1.bf16.msra.mxu0 %v2985_v18  ;;  %v2056_v18 = vld [vmem:[%s4378_s3 + $0xd8] sm:$0xff]  ;;  %v2058_v24 = vld [vmem:[%s4378_s3 + $0xe8] sm:$0xff]  ;;  %v842_v25 = vld [vmem:[%s4378_s3 + $0x40] sm:$0xff] }
  0x27   : > { %3002 = vmatpush3.bf16.msra.mxu1 %v2999_v13  ;;  %3004 = vmatprep.subr.bf16.mxu0 %v3003_v19  ;;  %v838_v13 = vld [vmem:[%s4378_s3 + $0x20] sm:$0xff]  ;;  %v840_v19 = vld [vmem:[%s4378_s3 + $0x30] sm:$0xff]  ;;  %v3051_v21 = vpack.c.bf16 %v2056_v18, %v2055_v17  ;;  %v843_v26 = vld [vmem:[%s4378_s3 + $0x48] sm:$0xff] }
  0x28   : > { %3020 = vmatprep.subr.bf16.mxu1 %v3019_v22  ;;  %v3066_v16 = vpack.c.bf16 %v839_v14, %v838_v13  ;;  %v2060_v30 = vld [vmem:[%s4378_s3 + $0xf8] sm:$0xff]  ;;  %v844_v31 = vld [vmem:[%s4378_s3 + $0x50] sm:$0xff]  ;;  %v846_v35 = vld [vmem:[%s4378_s3 + $0x60] sm:$0xff] }
  0x29   : > { %2013 = vmatmul.mubr.msk.f32.vlgmr.msra.gmra.mrb[0].mxu0 %vm232_vm1, %v235_v63  ;;  %v834_v63 = vld [vmem:[%s4378_s3] sm:$0xff]  ;;  %v847_v36 = vld [vmem:[%s4378_s3 + $0x68] sm:$0xff]  ;;  %v2063_v13 = vld [vmem:[%s4378_s3 + $0x110] sm:$0xff] }
  0x2a   : > { %2498 = vmatmul.mubr.msk.f32.vlgmr.msra.gmra.mrb[0].mxu1 %vm232_vm1, %v236_v28  ;;  %3006 = vmatpush1.bf16.msra.mxu0 %v3005_v27  ;;  %v3060_v2 = vpack.c.bf16 %v835_v0, %v834_v63  ;;  %v3054_v27 = vpack.c.bf16 %v2058_v24, %v2057_v23  ;;  %v231_v44 = vld [vmem:[%s4377_s2] sm:$0x7]  ;;  %v2064_v14 = vld [vmem:[%s4378_s3 + $0x118] sm:$0xff]  ;;  %v2066_v17 = vld [vmem:[%s4378_s3 + $0x128] sm:$0xff] }
  0x2b   : > { %3022 = vmatpush3.bf16.msra.mxu1 %v3019_v22  ;;  %3008 = vmatprep.subr.bf16.mxu0 %v3007_v29  ;;  %v3069_v22 = vpack.c.bf16 %v841_v20, %v840_v19  ;;  %v2059_v29 = vld [vmem:[%s4378_s3 + $0xf0] sm:$0xff]  ;;  %v2061_v6 = vld [vmem:[%s4378_s3 + $0x100] sm:$0xff]  ;;  %v2068_v20 = vld [vmem:[%s4378_s3 + $0x138] sm:$0xff] }
  0x2c   : > { %3024 = vmatprep.subr.bf16.mxu1 %v3023_v32  ;;  %522 = vmatprep.mubr.f32.mxu0 %v3355_v7  ;;  %v3057_v33 = vpack.c.bf16 %v2060_v30, %v2059_v29  ;;  %v2067_v19 = vld [vmem:[%s4378_s3 + $0x130] sm:$0xff]  ;;  %v2069_v23 = vld [vmem:[%s4378_s3 + $0x140] sm:$0xff]  ;;  %v2070_v24 = vld [vmem:[%s4378_s3 + $0x148] sm:$0xff] }
  0x2d   : > { %2014 = vmatmul.mubr.msk.f32.gmra.mrb[2].mxu0 %vm232_vm1, %v236_v28  ;;  %2516 = vmatprep.mubr.msk.f32.mxu1 %vm232_vm1, %v604_v38  ;;  %v3072_v28 = vpack.c.bf16 %v843_v26, %v842_v25  ;;  %v3096_v25 = vpack.c.bf16 %v2070_v24, %v2069_v23  ;;  %v2071_v26 = vld [vmem:[%s4378_s3 + $0x150] sm:$0xff]  ;;  %v2073_v29 = vld [vmem:[%s4378_s3 + $0x160] sm:$0xff]  ;;  %v2074_v30 = vld [vmem:[%s4378_s3 + $0x168] sm:$0xff] }
  0x2e   : > { %3010 = vmatpush1.bf16.msra.mxu0 %v3009_v37  ;;  %701 = vmatprep.mubr.f32.mxu0 %v3355_v7  ;;  %v3078_v37 = vpack.c.bf16 %v847_v36, %v846_v35  ;;  %v2094_v36 = vld [vmem:[%s4378_s3 + $0x200] sm:$0xff] }
  0x2f   : > { %3026 = vmatpush3.bf16.msra.mxu1 %v3023_v32  ;;  %3012 = vmatprep.subr.bf16.mxu0 %v3011_v39  ;;  %v845_v32 = vld [vmem:[%s4378_s3 + $0x58] sm:$0xff] }
  0x30   : > { %3028 = vmatprep.subr.bf16.mxu1 %v3027_v42  ;;  %v3075_v34 = vpack.c.bf16 %v845_v32, %v844_v31  ;;  %v849_v39 = vld [vmem:[%s4378_s3 + $0x78] sm:$0xff]  ;;  %v3102_v31 = vpack.c.bf16 %v2074_v30, %v2073_v29  ;;  %v2075_v32 = vld [vmem:[%s4378_s3 + $0x170] sm:$0xff] }
  0x32   : > { %3014 = vmatpush1.bf16.msra.mxu0 %v3013_v47 }
  0x33   : > { %3030 = vmatpush3.bf16.msra.mxu1 %v3027_v42  ;;  %3016 = vmatprep.subr.bf16.mxu0 %v3015_v48  ;;  %v797_v42 = vshrl.u32 %v796_v41, 7  ;;  %v2078_v41 = vld [vmem:[%s4378_s3 + $0x180] sm:$0xff] }
  0x34   : > { %3032 = vmatprep.subr.bf16.mxu1 %v3031_v51 }
  0x35   : > { %v798_v43 = vsub.s32 0, %v797_v42  ;;  %v802_v45 = vsub.s32 1, %v797_v42  ;;  %v806_v46 = vsub.s32 2, %v797_v42  ;;  %v2079_v42 = vld [vmem:[%s4378_s3 + $0x188] sm:$0xff] }
  0x36   : > { %3018 = vmatpush1.bf16.msra.mxu0 %v3017_v52 }
  0x37   : > { %3034 = vmatpush3.bf16.msra.mxu1 %v3031_v51  ;;  %3035 = vmatprep.subr.bf16.mxu0 %v3356_v57  ;;  %v799_v47 = vrot.slane %v231_v44, %v798_v43  ;;  %v803_v48 = vrot.slane %v231_v44, %v802_v45  ;;  %v807_v50 = vrot.slane %v231_v44, %v806_v46  ;;  %v2080_v44 = vld [vmem:[%s4378_s3 + $0x190] sm:$0xff]  ;;  %v2081_v46 = vld [vmem:[%s4378_s3 + $0x198] sm:$0xff] }
  0x38   : > { %3059 = vmatprep.subr.bf16.mxu1 %v3356_v57  ;;  %v3132_v45 = vpack.c.bf16 %v2079_v42, %v2078_v41  ;;  %v2115_v41 = vld [vmem:[%s4378_s3 + $0x2a8] sm:$0xff] }
  0x39   : > { %2041 = vmatmul.mubr.msk.f32.vlgmr.msra.gmra.mrb[0].mxu0 %vm232_vm1, %v604_v38  ;;  %v848_v38 = vld [vmem:[%s4378_s3 + $0x70] sm:$0xff] }
  0x3a   : > { %2517 = vmatmul.mubr.msk.f32.vlgmr.msra.gmra.mrb[0].mxu1 %vm232_vm1, %v605_v53  ;;  %707 = vmatprep.mubr.f32.mxu0 %v3355_v7  ;;  %v3081_v40 = vpack.c.bf16 %v849_v39, %v848_v38  ;;  %v2096_v39 = vld [vmem:[%s4378_s3 + $0x210] sm:$0xff] }
  0x3b   : > { %3037 = vmatpush3.bf16.msra.mxu0 %v3036_v56  ;;  %3061 = vmatpush3.bf16.msra.mxu1 %v3060_v2 }
  0x3c   : > { %3038 = vmatprep.subr.bf16.mxu0 %v3356_v57  ;;  %3062 = vmatprep.subr.bf16.mxu1 %v3356_v57 }
  0x3d   : > { %2042 = vmatmul.mubr.msk.f32.gmra.mrb[2].mxu0 %vm232_vm1, %v605_v53  ;;  %2586 = vmatprep.mubr.msk.f32.mxu1 %vm3358_vm2, %v3355_v7 }
  0x3e   : > { %2551 = vmatprep.mubr.msk.f32.mxu0 %vm3358_vm2, %v3355_v7 }
  0x3f   : > { %3040 = vmatpush3.bf16.msra.mxu0 %v3039_v60  ;;  %3064 = vmatpush3.bf16.msra.mxu1 %v3063_v9 }
  0x40   : > { %3041 = vmatprep.subr.bf16.mxu0 %v3356_v57  ;;  %3065 = vmatprep.subr.bf16.mxu1 %v3356_v57 }
  0x43   : > { %3043 = vmatpush3.bf16.msra.mxu0 %v3042_v1  ;;  %3067 = vmatpush3.bf16.msra.mxu1 %v3066_v16  ;;  %v2065_v16 = vld [vmem:[%s4378_s3 + $0x120] sm:$0xff] }
  0x44   : > { %3044 = vmatprep.subr.bf16.mxu0 %v3356_v57  ;;  %3068 = vmatprep.subr.bf16.mxu1 %v3356_v57  ;;  %v3090_v18 = vpack.c.bf16 %v2066_v17, %v2065_v16  ;;  %v2090_v17 = vld [vmem:[%s4378_s3 + $0x1e0] sm:$0xff] }
  0x47   : > { %3046 = vmatpush3.bf16.msra.mxu0 %v3045_v8  ;;  %3070 = vmatpush3.bf16.msra.mxu1 %v3069_v22  ;;  %v2062_v8 = vld [vmem:[%s4378_s3 + $0x108] sm:$0xff]  ;;  %v3093_v22 = vpack.c.bf16 %v2068_v20, %v2067_v19  ;;  %v2092_v20 = vld [vmem:[%s4378_s3 + $0x1f0] sm:$0xff] }
  0x48   : > { %3047 = vmatprep.subr.bf16.mxu0 %v3356_v57  ;;  %3071 = vmatprep.subr.bf16.mxu1 %v3356_v57  ;;  %v3084_v11 = vpack.c.bf16 %v2062_v8, %v2061_v6  ;;  %v2087_v6 = vld [vmem:[%s4378_s3 + $0x1c8] sm:$0xff] }
  0x4b   : > { %3049 = vmatpush3.bf16.msra.mxu0 %v3048_v15  ;;  %3073 = vmatpush3.bf16.msra.mxu1 %v3072_v28  ;;  %v3087_v15 = vpack.c.bf16 %v2064_v14, %v2063_v13  ;;  %v2088_v13 = vld [vmem:[%s4378_s3 + $0x1d0] sm:$0xff]  ;;  %v2089_v14 = vld [vmem:[%s4378_s3 + $0x1d8] sm:$0xff] }
  0x4c   : > { %3050 = vmatprep.subr.bf16.mxu0 %v3356_v57  ;;  %3074 = vmatprep.subr.bf16.mxu1 %v3356_v57  ;;  %v3147_v16 = vpack.c.bf16 %v2089_v14, %v2088_v13  ;;  %v2131_v14 = vld [vmem:[%s4378_s3 + $0x320] sm:$0xff] }
  0x4f   : > { %3052 = vmatpush3.bf16.msra.mxu0 %v3051_v21  ;;  %3076 = vmatpush3.bf16.msra.mxu1 %v3075_v34 }
  0x50   : > { %3053 = vmatprep.subr.bf16.mxu0 %v3356_v57  ;;  %3077 = vmatprep.subr.bf16.mxu1 %v3356_v57 }
  0x53   : > { %3055 = vmatpush3.bf16.msra.mxu0 %v3054_v27  ;;  %3079 = vmatpush3.bf16.msra.mxu1 %v3078_v37  ;;  %v2072_v27 = vld [vmem:[%s4378_s3 + $0x158] sm:$0xff]  ;;  %v2095_v37 = vld [vmem:[%s4378_s3 + $0x208] sm:$0xff] }
  0x54   : > { %3056 = vmatprep.subr.bf16.mxu0 %v3356_v57  ;;  %3080 = vmatprep.subr.bf16.mxu1 %v3356_v57  ;;  %v3099_v28 = vpack.c.bf16 %v2072_v27, %v2071_v26  ;;  %v3108_v38 = vpack.c.bf16 %v2095_v37, %v2094_v36  ;;  %v2112_v37 = vld [vmem:[%s4378_s3 + $0x290] sm:$0xff] }
  0x57   : > { %3058 = vmatpush3.bf16.msra.mxu0 %v3057_v33  ;;  %3082 = vmatpush3.bf16.msra.mxu1 %v3081_v40  ;;  %v2076_v33 = vld [vmem:[%s4378_s3 + $0x178] sm:$0xff] }
  0x58   : > { %3083 = vmatprep.subr.bf16.mxu0 %v3356_v57  ;;  %3107 = vmatprep.subr.bf16.mxu1 %v3356_v57  ;;  %v3105_v34 = vpack.c.bf16 %v2076_v33, %v2075_v32  ;;  %v2097_v40 = vld [vmem:[%s4378_s3 + $0x218] sm:$0xff]  ;;  %v2110_v32 = vld [vmem:[%s4378_s3 + $0x280] sm:$0xff]  ;;  %v2111_v33 = vld [vmem:[%s4378_s3 + $0x288] sm:$0xff] }
  0x59   : > { %v3111_v43 = vpack.c.bf16 %v2097_v40, %v2096_v39  ;;  %v2114_v40 = vld [vmem:[%s4378_s3 + $0x2a0] sm:$0xff] }
  0x5a   : > { %v3162_v42 = vpack.c.bf16 %v2115_v41, %v2114_v40  ;;  %v2139_v41 = vld [vmem:[%s4378_s3 + $0x360] sm:$0xff] }
 0x10c   : > { %v703_v49 = vpop.f32.mrb[0].mxu0 }
 0x10d   : > { %v811_v51 = vadd.f32 %v799_v47, %v703_v49  ;;  %v2518_v52 = vpop.f32.mrb[0].mxu1  ;;  %v705_v53 = vpop.f32.mrb[1].mxu0 }
 0x10e   : > { %v812_v54 = vadd.f32 %v803_v48, %v705_v53  ;;  %v780_v55 = vpop.f32.mrb[1].mxu1  ;;  %v816_v0 = vadd.f32 %v2518_v52, %v807_v50  ;;  %v2101_v52 = vld [vmem:[%s4378_s3 + $0x238] sm:$0xff]  ;;  %v2082_v53 = vld [vmem:[%s4378_s3 + $0x1a0] sm:$0xff] }
 0x10f   : > { %v813_v58 = vadd.f32 %v807_v50, %v780_v55  ;;  %v3135_v50 = vpack.c.bf16 %v2081_v46, %v2080_v44  ;;  %v2117_v44 = vld [vmem:[%s4378_s3 + $0x2b8] sm:$0xff] }
 0x110   : > { %v817_v56 = vmax.f32 %v811_v51, %v812_v54  ;;  %v709_v59 = vpop.f32.mrb[2].mxu0  ;;  %v2100_v51 = vld [vmem:[%s4378_s3 + $0x230] sm:$0xff]  ;;  %v2083_v54 = vld [vmem:[%s4378_s3 + $0x1a8] sm:$0xff] }
 0x111   : > { %v814_v60 = vadd.f32 %v799_v47, %v709_v59  ;;  %v711_v61 = vpop.f32.mrb[3].mxu0  ;;  %v2098_v47 = vld [vmem:[%s4378_s3 + $0x220] sm:$0xff]  ;;  %v3117_v55 = vpack.c.bf16 %v2101_v52, %v2100_v51  ;;  %v2103_v59 = vld [vmem:[%s4378_s3 + $0x248] sm:$0xff]  ;;  %v2121_v51 = vld [vmem:[%s4378_s3 + $0x2d8] sm:$0xff] }
 0x112   : > { %v819_v62 = vmax.f32 %v817_v56, %v813_v58  ;;  %v815_v63 = vadd.f32 %v803_v48, %v711_v61  ;;  %v2099_v48 = vld [vmem:[%s4378_s3 + $0x228] sm:$0xff]  ;;  %v3138_v56 = vpack.c.bf16 %v2083_v54, %v2082_v53  ;;  %v2102_v58 = vld [vmem:[%s4378_s3 + $0x240] sm:$0xff]  ;;  %v2085_v61 = vld [vmem:[%s4378_s3 + $0x1b8] sm:$0xff] }
 0x113   : > { %v3114_v49 = vpack.c.bf16 %v2099_v48, %v2098_v47  ;;  %v2118_v47 = vld [vmem:[%s4378_s3 + $0x2c0] sm:$0xff]  ;;  %v2119_v48 = vld [vmem:[%s4378_s3 + $0x2c8] sm:$0xff] }
 0x114   : > { %821 = vst [vmem:[#allocation3 + $0x1] sm:$0xff] %v819_v62  ;;  %v818_v1 = vmax.f32 %v814_v60, %v815_v63  ;;  %v2084_v60 = vld [vmem:[%s4378_s3 + $0x1b0] sm:$0xff]  ;;  %v3120_v62 = vpack.c.bf16 %v2103_v59, %v2102_v58  ;;  %v2122_v53 = vld [vmem:[%s4378_s3 + $0x2e0] sm:$0xff]  ;;  %v2123_v54 = vld [vmem:[%s4378_s3 + $0x2e8] sm:$0xff] }
 0x115   : > { %v3141_v63 = vpack.c.bf16 %v2085_v61, %v2084_v60  ;;  %v2125_v58 = vld [vmem:[%s4378_s3 + $0x2f8] sm:$0xff]  ;;  %v2143_v61 = vld [vmem:[%s4378_s3 + $0x380] sm:$0xff] }
 0x116   : > { %v820_v2 = vmax.f32 %v818_v1, %v816_v0  ;;  %v2104_v0 = vld [vmem:[%s4378_s3 + $0x250] sm:$0xff]  ;;  %v2105_v1 = vld [vmem:[%s4378_s3 + $0x258] sm:$0xff] }
 0x118   : > { %822 = vst [vmem:[#allocation3 + $0x9] sm:$0xff] %v820_v2  ;;  %v3123_v2 = vpack.c.bf16 %v2105_v1, %v2104_v0  ;;  %v2127_v0 = vld [vmem:[%s4378_s3 + $0x300] sm:$0xff]  ;;  %v2128_v1 = vld [vmem:[%s4378_s3 + $0x308] sm:$0xff] }
 0x11f   : > { %v823_v3 = vld [vmem:[#allocation3] ss:$2 sm:$0xff]  ;;  %v825_v4 = vld [vmem:[#allocation3 + $0x1] ss:$2 sm:$0xff] }
 0x120   : > { %v826_v5 = vmax.f32 %v823_v3, %v825_v4  ;;  %v828_v9 = vld [vmem:[#allocation3 + $0x2] ss:$2 sm:$0xff] }
 0x121   : > { %v2106_v3 = vld [vmem:[%s4378_s3 + $0x260] sm:$0xff]  ;;  %v2107_v4 = vld [vmem:[%s4378_s3 + $0x268] sm:$0xff] }
 0x122   : > { %v3776_v10 = vmax.f32 %v826_v5, %v828_v9  ;;  %v2086_v5 = vld [vmem:[%s4378_s3 + $0x1c0] sm:$0xff]  ;;  %v3126_v8 = vpack.c.bf16 %v2107_v4, %v2106_v3  ;;  %v3204_v3 = vpack.c.bf16 %v2128_v1, %v2127_v0  ;;  %v2146_v4 = vld [vmem:[%s4378_s3 + $0x398] sm:$0xff] }
 0x123   : > { %v3144_v9 = vpack.c.bf16 %v2087_v6, %v2086_v5  ;;  %v2129_v5 = vld [vmem:[%s4378_s3 + $0x310] sm:$0xff]  ;;  %v2130_v6 = vld [vmem:[%s4378_s3 + $0x318] sm:$0xff] }
 0x124   : > { %v831_v12 = vmax.f32 %v3776_v10, 0.0  ;;  %v2162_v0 = vld [vmem:[%s4378_s3 + $0x418] sm:$0xff] }
 0x126   : > { %832 = vst [vmem:[#allocation4 + $0x1] sm:$0xff] %v831_v12  ;;  %2552 = vmatmul.mubr.f32.vlgmr.msra.gmra.mrb[4].mxu0 %v831_v12  ;;  %v2109_v12 = vld [vmem:[%s4378_s3 + $0x278] sm:$0xff] }
 0x127   : > { %3085 = vmatpush3.bf16.msra.mxu0 %v3084_v11  ;;  %2621 = vmatprep.mubr.msk.f32.mxu0 %vm3358_vm2, %v3355_v7  ;;  %v2108_v11 = vld [vmem:[%s4378_s3 + $0x270] sm:$0xff] }
 0x128   : > { %3086 = vmatprep.subr.bf16.mxu0 %v3356_v57 }
 0x12b   : > { %3088 = vmatpush3.bf16.msra.mxu0 %v3087_v15  ;;  %v3129_v15 = vpack.c.bf16 %v2109_v12, %v2108_v11  ;;  %v2148_v11 = vld [vmem:[%s4378_s3 + $0x3a8] sm:$0xff]  ;;  %v3207_v12 = vpack.c.bf16 %v2130_v6, %v2129_v5  ;;  %v2166_v5 = vld [vmem:[%s4378_s3 + $0x438] sm:$0xff] }
 0x12c   : > { %3089 = vmatprep.subr.bf16.mxu0 %v3356_v57 }
 0x12d   : > { %v833_v21 = vld [vmem:[#allocation4] sm:$0xff] }
 0x12e   : > { %2587 = vmatmul.mubr.f32.vlgmr.msra.gmra.mrb[2].mxu1 %v833_v21  ;;  %v1008_v35 = vld [vmem:[#allocation4 + $0x2] sm:$0xff] }
 0x12f   : > { %3091 = vmatpush3.bf16.msra.mxu0 %v3090_v18  ;;  %2656 = vmatprep.mubr.msk.f32.mxu1 %vm3358_vm2, %v3355_v7  ;;  %v2091_v18 = vld [vmem:[%s4378_s3 + $0x1e8] sm:$0xff]  ;;  %v2093_v21 = vld [vmem:[%s4378_s3 + $0x1f8] sm:$0xff] }
 0x130   : > { %3092 = vmatprep.subr.bf16.mxu0 %v3356_v57  ;;  %3109 = vmatpush3.bf16.msra.mxu1 %v3108_v38  ;;  %v3150_v19 = vpack.c.bf16 %v2091_v18, %v2090_v17  ;;  %v2113_v38 = vld [vmem:[%s4378_s3 + $0x298] sm:$0xff] }
 0x131   : > { %3110 = vmatprep.subr.bf16.mxu1 %v3356_v57  ;;  %v3159_v39 = vpack.c.bf16 %v2113_v38, %v2112_v37  ;;  %v2150_v17 = vld [vmem:[%s4378_s3 + $0x3b8] sm:$0xff]  ;;  %v2137_v37 = vld [vmem:[%s4378_s3 + $0x350] sm:$0xff] }
 0x132   : > { %v2138_v38 = vld [vmem:[%s4378_s3 + $0x358] sm:$0xff] }
 0x133   : > { %3094 = vmatpush3.bf16.msra.mxu0 %v3093_v22  ;;  %v3153_v22 = vpack.c.bf16 %v2093_v21, %v2092_v20  ;;  %v2133_v20 = vld [vmem:[%s4378_s3 + $0x330] sm:$0xff]  ;;  %v2134_v21 = vld [vmem:[%s4378_s3 + $0x338] sm:$0xff]  ;;  %v3219_v40 = vpack.c.bf16 %v2138_v38, %v2137_v37 }
 0x134   : > { %3095 = vmatprep.subr.bf16.mxu0 %v3356_v57  ;;  %3112 = vmatpush3.bf16.msra.mxu1 %v3111_v43  ;;  %v2116_v43 = vld [vmem:[%s4378_s3 + $0x2b0] sm:$0xff] }
 0x135   : > { %3113 = vmatprep.subr.bf16.mxu1 %v3356_v57  ;;  %v3165_v46 = vpack.c.bf16 %v2117_v44, %v2116_v43  ;;  %v2141_v44 = vld [vmem:[%s4378_s3 + $0x370] sm:$0xff] }
 0x136   : > { %v2198_v38 = vld [vmem:[%s4378_s3 + $0x530] sm:$0xff] }
 0x137   : > { %3097 = vmatpush3.bf16.msra.mxu0 %v3096_v25 }
 0x138   : > { %3098 = vmatprep.subr.bf16.mxu0 %v3356_v57  ;;  %3115 = vmatpush3.bf16.msra.mxu1 %v3114_v49  ;;  %v3168_v49 = vpack.c.bf16 %v2119_v48, %v2118_v47 }
 0x139   : > { %3116 = vmatprep.subr.bf16.mxu1 %v3356_v57 }
 0x13b   : > { %3100 = vmatpush3.bf16.msra.mxu0 %v3099_v28  ;;  %v2077_v28 = vld [vmem:[%s4379_s4] ss:$0 sm:$0xff] }
 0x13c   : > { %3101 = vmatprep.subr.bf16.mxu0 %v3356_v57  ;;  %3118 = vmatpush3.bf16.msra.mxu1 %v3117_v55  ;;  %v3174_v55 = vpack.c.bf16 %v2123_v54, %v2122_v53 }
 0x13d   : > { %3119 = vmatprep.subr.bf16.mxu1 %v3356_v57 }
 0x13f   : > { %3103 = vmatpush3.bf16.msra.mxu0 %v3102_v31 }
 0x140   : > { %3104 = vmatprep.subr.bf16.mxu0 %v3356_v57  ;;  %3121 = vmatpush3.bf16.msra.mxu1 %v3120_v62  ;;  %v2144_v62 = vld [vmem:[%s4378_s3 + $0x388] sm:$0xff] }
 0x141   : > { %3122 = vmatprep.subr.bf16.mxu1 %v3356_v57 }
 0x143   : > { %3106 = vmatpush3.bf16.msra.mxu0 %v3105_v34 }
 0x144   : > { %3131 = vmatprep.subr.bf16.mxu0 %v3356_v57  ;;  %3124 = vmatpush3.bf16.msra.mxu1 %v3123_v2  ;;  %v2145_v2 = vld [vmem:[%s4378_s3 + $0x390] sm:$0xff] }
 0x145   : > { %3125 = vmatprep.subr.bf16.mxu1 %v3356_v57 }
 0x146   : > { %2622 = vmatmul.mubr.f32.vlgmr.msra.gmra.mrb[6].mxu0 %v1008_v35  ;;  %v3156_v35 = vpack.c.bf16 %v2111_v33, %v2110_v32  ;;  %v2136_v32 = vld [vmem:[%s4378_s3 + $0x348] sm:$0xff] }
 0x147   : > { %2691 = vmatprep.mubr.msk.f32.mxu0 %vm3358_vm2, %v3355_v7  ;;  %3133 = vmatpush3.bf16.msra.mxu0 %v3132_v45 }
 0x148   : > { %3134 = vmatprep.subr.bf16.mxu0 %v3356_v57  ;;  %3127 = vmatpush3.bf16.msra.mxu1 %v3126_v8  ;;  %v3183_v8 = vpack.c.bf16 %v2146_v4, %v2145_v2  ;;  %v2164_v2 = vld [vmem:[%s4378_s3 + $0x428] sm:$0xff]  ;;  %v2165_v4 = vld [vmem:[%s4378_s3 + $0x430] sm:$0xff] }
 0x149   : > { %3128 = vmatprep.subr.bf16.mxu1 %v3356_v57 }
 0x14b   : > { %3136 = vmatpush3.bf16.msra.mxu0 %v3135_v50  ;;  %v2120_v50 = vld [vmem:[%s4378_s3 + $0x2d0] sm:$0xff] }
 0x14c   : > { %3137 = vmatprep.subr.bf16.mxu0 %v3356_v57  ;;  %3130 = vmatpush3.bf16.msra.mxu1 %v3129_v15  ;;  %v3171_v52 = vpack.c.bf16 %v2121_v51, %v2120_v50  ;;  %v2132_v15 = vld [vmem:[%s4378_s3 + $0x328] sm:$0xff] }
 0x14d   : > { %3155 = vmatprep.subr.bf16.mxu1 %v3356_v57  ;;  %v3210_v18 = vpack.c.bf16 %v2132_v15, %v2131_v14  ;;  %v2170_v14 = vld [vmem:[%s4378_s3 + $0x458] sm:$0xff] }
 0x14f   : > { %3139 = vmatpush3.bf16.msra.mxu0 %v3138_v56  ;;  %v2124_v56 = vld [vmem:[%s4378_s3 + $0x2f0] sm:$0xff] }
 0x150   : > { %3140 = vmatprep.subr.bf16.mxu0 %v3356_v57  ;;  %v3177_v59 = vpack.c.bf16 %v2125_v58, %v2124_v56  ;;  %v2159_v58 = vld [vmem:[%s4378_s3 + $0x400] sm:$0xff] }
 0x153   : > { %3142 = vmatpush3.bf16.msra.mxu0 %v3141_v63  ;;  %v3180_v63 = vpack.c.bf16 %v2144_v62, %v2143_v61 }
 0x154   : > { %3143 = vmatprep.subr.bf16.mxu0 %v3356_v57 }
 0x157   : > { %3145 = vmatpush3.bf16.msra.mxu0 %v3144_v9  ;;  %v2147_v9 = vld [vmem:[%s4378_s3 + $0x3a0] sm:$0xff] }
 0x158   : > { %3146 = vmatprep.subr.bf16.mxu0 %v3356_v57  ;;  %v3186_v13 = vpack.c.bf16 %v2148_v11, %v2147_v9  ;;  %v2167_v9 = vld [vmem:[%s4378_s3 + $0x440] sm:$0xff]  ;;  %v2168_v11 = vld [vmem:[%s4378_s3 + $0x448] sm:$0xff] }
 0x15b   : > { %3148 = vmatpush3.bf16.msra.mxu0 %v3147_v16  ;;  %v2149_v16 = vld [vmem:[%s4378_s3 + $0x3b0] sm:$0xff] }
 0x15c   : > { %3149 = vmatprep.subr.bf16.mxu0 %v3356_v57 }
 0x15f   : > { %3151 = vmatpush3.bf16.msra.mxu0 %v3150_v19  ;;  %v3189_v19 = vpack.c.bf16 %v2150_v17, %v2149_v16  ;;  %v2171_v16 = vld [vmem:[%s4378_s3 + $0x460] sm:$0xff]  ;;  %v2172_v17 = vld [vmem:[%s4378_s3 + $0x468] sm:$0xff] }
 0x160   : > { %3152 = vmatprep.subr.bf16.mxu0 %v3356_v57 }
 0x163   : > { %3154 = vmatpush3.bf16.msra.mxu0 %v3153_v22  ;;  %v3213_v22 = vpack.c.bf16 %v2134_v21, %v2133_v20  ;;  %v2174_v20 = vld [vmem:[%s4378_s3 + $0x478] sm:$0xff] }
 0x164   : > { %3179 = vmatprep.subr.bf16.mxu0 %v3356_v57 }
 0x1f9   : > { %v934_v23 = vpop.f32.mrb[4].mxu0 }
 0x1fa   : > { %v2553_v24 = vpop.f32.mrb[5].mxu0 }
 0x1fb   : > { %v2152_v24 = vld [vmem:[%s4378_s3 + $0x3c8] sm:$0xff] }
 0x201   : > { %v1004_v25 = vpop.f32.mrb[2].mxu1 }
 0x202   : > { %v1005_v26 = vadd.f32 %v1004_v25, %v934_v23  ;;  %v2588_v27 = vpop.f32.mrb[3].mxu1  ;;  %v2151_v23 = vld [vmem:[%s4378_s3 + $0x3c0] sm:$0xff] }
 0x203   : > { %v3192_v25 = vpack.c.bf16 %v2152_v24, %v2151_v23  ;;  %v2154_v27 = vld [vmem:[%s4378_s3 + $0x3d8] sm:$0xff]  ;;  %v2192_v23 = vld [vmem:[%s4378_s3 + $0x500] sm:$0xff]  ;;  %v2193_v24 = vld [vmem:[%s4378_s3 + $0x508] sm:$0xff] }
 0x219   : > { %v1092_v29 = vpop.f32.mrb[6].mxu0 }
 0x21a   : > { %v1096_v30 = vadd.f32 %v1092_v29, %v1005_v26  ;;  %v2623_v31 = vpop.f32.mrb[7].mxu0  ;;  %v2153_v26 = vld [vmem:[%s4378_s3 + $0x3d0] sm:$0xff]  ;;  %v2155_v29 = vld [vmem:[%s4378_s3 + $0x3e0] sm:$0xff] }
 0x21b   : > { %v2135_v31 = vld [vmem:[%s4378_s3 + $0x340] sm:$0xff] }
 0x21c   : > { %v1101_v34 = vadd.f32 %v2077_v28, %v1096_v30  ;;  %v3195_v28 = vpack.c.bf16 %v2154_v27, %v2153_v26  ;;  %v2156_v30 = vld [vmem:[%s4378_s3 + $0x3e8] sm:$0xff]  ;;  %v2194_v26 = vld [vmem:[%s4378_s3 + $0x510] sm:$0xff]  ;;  %v2195_v27 = vld [vmem:[%s4378_s3 + $0x518] sm:$0xff] }
 0x21d   : > { %v3198_v33 = vpack.c.bf16 %v2156_v30, %v2155_v29  ;;  %v2177_v29 = vld [vmem:[%s4378_s3 + $0x488] sm:$0xff]  ;;  %v3255_v30 = vpack.c.bf16 %v2195_v27, %v2194_v26  ;;  %v2212_v27 = vld [vmem:[%s4378_s3 + $0x5a0] sm:$0xff] }
 0x21e   : > { %v1103_v36 = vmax.f32 %v1101_v34, 0.0  ;;  %v3216_v34 = vpack.c.bf16 %v2136_v32, %v2135_v31  ;;  %v2178_v31 = vld [vmem:[%s4378_s3 + $0x490] sm:$0xff] }
 0x220   : > { %1104 = vst [vmem:[#allocation4 + $0x1] sm:$0xff] %v1103_v36  ;;  %2657 = vmatmul.mubr.f32.vlgmr.msra.gmra.mrb[4].mxu1 %v1103_v36  ;;  %v2158_v36 = vld [vmem:[%s4378_s3 + $0x3f8] sm:$0xff] }
 0x221   : > { %3157 = vmatpush3.bf16.msra.mxu1 %v3156_v35  ;;  %2726 = vmatprep.mubr.msk.f32.mxu1 %vm3358_vm2, %v3355_v7  ;;  %v2157_v35 = vld [vmem:[%s4378_s3 + $0x3f0] sm:$0xff] }
 0x222   : > { %3158 = vmatprep.subr.bf16.mxu1 %v3356_v57 }
 0x225   : > { %3160 = vmatpush3.bf16.msra.mxu1 %v3159_v39  ;;  %v3201_v39 = vpack.c.bf16 %v2158_v36, %v2157_v35  ;;  %v2197_v35 = vld [vmem:[%s4378_s3 + $0x528] sm:$0xff] }
 0x226   : > { %3161 = vmatprep.subr.bf16.mxu1 %v3356_v57 }
 0x227   : > { %v1105_v45 = vld [vmem:[#allocation4] sm:$0xff] }
 0x228   : > { %2692 = vmatmul.mubr.f32.vlgmr.msra.gmra.mrb[8].mxu0 %v1105_v45  ;;  %v1281_v60 = vld [vmem:[#allocation4 + $0x2] sm:$0xff] }
 0x229   : > { %3163 = vmatpush3.bf16.msra.mxu1 %v3162_v42  ;;  %2761 = vmatprep.mubr.msk.f32.mxu0 %vm3358_vm2, %v3355_v7  ;;  %v2140_v42 = vld [vmem:[%s4378_s3 + $0x368] sm:$0xff]  ;;  %v2142_v45 = vld [vmem:[%s4378_s3 + $0x378] sm:$0xff] }
 0x22a   : > { %3164 = vmatprep.subr.bf16.mxu1 %v3356_v57  ;;  %3181 = vmatpush3.bf16.msra.mxu0 %v3180_v63  ;;  %v3222_v43 = vpack.c.bf16 %v2140_v42, %v2139_v41  ;;  %v2161_v63 = vld [vmem:[%s4378_s3 + $0x410] sm:$0xff]  ;;  %v2181_v41 = vld [vmem:[%s4378_s3 + $0x4a8] sm:$0xff] }
 0x22b   : > { %3182 = vmatprep.subr.bf16.mxu0 %v3356_v57  ;;  %v3231_v1 = vpack.c.bf16 %v2162_v0, %v2161_v63  ;;  %v2186_v63 = vld [vmem:[%s4378_s3 + $0x4d0] sm:$0xff]  ;;  %v2187_v0 = vld [vmem:[%s4378_s3 + $0x4d8] sm:$0xff] }
 0x22d   : > { %3166 = vmatpush3.bf16.msra.mxu1 %v3165_v46  ;;  %v3225_v46 = vpack.c.bf16 %v2142_v45, %v2141_v44  ;;  %v2200_v44 = vld [vmem:[%s4378_s3 + $0x540] sm:$0xff]  ;;  %v2201_v45 = vld [vmem:[%s4378_s3 + $0x548] sm:$0xff] }
 0x22e   : > { %3167 = vmatprep.subr.bf16.mxu1 %v3356_v57  ;;  %3184 = vmatpush3.bf16.msra.mxu0 %v3183_v8  ;;  %v3237_v8 = vpack.c.bf16 %v2166_v5, %v2165_v4  ;;  %v2190_v5 = vld [vmem:[%s4378_s3 + $0x4f0] sm:$0xff] }
 0x22f   : > { %3185 = vmatprep.subr.bf16.mxu0 %v3356_v57 }
 0x231   : > { %3169 = vmatpush3.bf16.msra.mxu1 %v3168_v49 }
 0x232   : > { %3170 = vmatprep.subr.bf16.mxu1 %v3356_v57  ;;  %3187 = vmatpush3.bf16.msra.mxu0 %v3186_v13  ;;  %v2169_v13 = vld [vmem:[%s4378_s3 + $0x450] sm:$0xff] }
 0x233   : > { %3188 = vmatprep.subr.bf16.mxu0 %v3356_v57  ;;  %v3243_v15 = vpack.c.bf16 %v2170_v14, %v2169_v13 }
 0x235   : > { %3172 = vmatpush3.bf16.msra.mxu1 %v3171_v52  ;;  %v2126_v52 = vld [vmem:[%s4379_s4 + $0x1] ss:$0 sm:$0xff] }
 0x236   : > { %3173 = vmatprep.subr.bf16.mxu1 %v3356_v57  ;;  %3190 = vmatpush3.bf16.msra.mxu0 %v3189_v19  ;;  %v2173_v19 = vld [vmem:[%s4378_s3 + $0x470] sm:$0xff] }
 0x237   : > { %3191 = vmatprep.subr.bf16.mxu0 %v3356_v57  ;;  %v3249_v21 = vpack.c.bf16 %v2174_v20, %v2173_v19  ;;  %v2208_v19 = vld [vmem:[%s4378_s3 + $0x580] sm:$0xff]  ;;  %v2209_v20 = vld [vmem:[%s4378_s3 + $0x588] sm:$0xff] }
 0x239   : > { %3175 = vmatpush3.bf16.msra.mxu1 %v3174_v55 }
 0x23a   : > { %3176 = vmatprep.subr.bf16.mxu1 %v3356_v57  ;;  %3193 = vmatpush3.bf16.msra.mxu0 %v3192_v25  ;;  %v3252_v25 = vpack.c.bf16 %v2193_v24, %v2192_v23  ;;  %v2210_v24 = vld [vmem:[%s4378_s3 + $0x590] sm:$0xff] }
 0x23b   : > { %3194 = vmatprep.subr.bf16.mxu0 %v3356_v57 }
 0x23d   : > { %3178 = vmatpush3.bf16.msra.mxu1 %v3177_v59  ;;  %v2160_v59 = vld [vmem:[%s4378_s3 + $0x408] sm:$0xff] }
 0x23e   : > { %3203 = vmatprep.subr.bf16.mxu1 %v3356_v57  ;;  %3196 = vmatpush3.bf16.msra.mxu0 %v3195_v28  ;;  %v3228_v61 = vpack.c.bf16 %v2160_v59, %v2159_v58  ;;  %v2176_v28 = vld [vmem:[%s4378_s3 + $0x480] sm:$0xff] }
 0x23f   : > { %3197 = vmatprep.subr.bf16.mxu0 %v3356_v57  ;;  %v3276_v32 = vpack.c.bf16 %v2177_v29, %v2176_v28  ;;  %v2213_v28 = vld [vmem:[%s4378_s3 + $0x5a8] sm:$0xff] }
 0x240   : > { %2727 = vmatmul.mubr.f32.vlgmr.msra.gmra.mrb[6].mxu1 %v1281_v60  ;;  %v3306_v29 = vpack.c.bf16 %v2213_v28, %v2212_v27 }
 0x241   : > { %2796 = vmatprep.mubr.msk.f32.mxu1 %vm3358_vm2, %v3355_v7  ;;  %3205 = vmatpush3.bf16.msra.mxu1 %v3204_v3 }
 0x242   : > { %3206 = vmatprep.subr.bf16.mxu1 %v3356_v57  ;;  %3199 = vmatpush3.bf16.msra.mxu0 %v3198_v33  ;;  %v2179_v33 = vld [vmem:[%s4378_s3 + $0x498] sm:$0xff] }
 0x243   : > { %3200 = vmatprep.subr.bf16.mxu0 %v3356_v57  ;;  %v3279_v37 = vpack.c.bf16 %v2179_v33, %v2178_v31  ;;  %v2216_v33 = vld [vmem:[%s4378_s3 + $0x5c0] sm:$0xff] }
 0x245   : > { %3208 = vmatpush3.bf16.msra.mxu1 %v3207_v12  ;;  %v3240_v12 = vpack.c.bf16 %v2168_v11, %v2167_v9 }
 0x246   : > { %3209 = vmatprep.subr.bf16.mxu1 %v3356_v57  ;;  %3202 = vmatpush3.bf16.msra.mxu0 %v3201_v39  ;;  %v2199_v39 = vld [vmem:[%s4378_s3 + $0x538] sm:$0xff] }
 0x247   : > { %3227 = vmatprep.subr.bf16.mxu0 %v3356_v57  ;;  %v3261_v42 = vpack.c.bf16 %v2199_v39, %v2198_v38  ;;  %v2220_v39 = vld [vmem:[%s4378_s3 + $0x5e0] sm:$0xff] }
 0x249   : > { %3211 = vmatpush3.bf16.msra.mxu1 %v3210_v18  ;;  %v3246_v18 = vpack.c.bf16 %v2172_v17, %v2171_v16 }
 0x24a   : > { %3212 = vmatprep.subr.bf16.mxu1 %v3356_v57 }
 0x24d   : > { %3214 = vmatpush3.bf16.msra.mxu1 %v3213_v22 }
 0x24e   : > { %3215 = vmatprep.subr.bf16.mxu1 %v3356_v57 }
 0x251   : > { %3217 = vmatpush3.bf16.msra.mxu1 %v3216_v34  ;;  %v2196_v34 = vld [vmem:[%s4378_s3 + $0x520] sm:$0xff] }
 0x252   : > { %3218 = vmatprep.subr.bf16.mxu1 %v3356_v57  ;;  %v3258_v36 = vpack.c.bf16 %v2197_v35, %v2196_v34  ;;  %v2217_v34 = vld [vmem:[%s4378_s3 + $0x5c8] sm:$0xff] }
 0x253   : > { %v3312_v35 = vpack.c.bf16 %v2217_v34, %v2216_v33 }
 0x255   : > { %3220 = vmatpush3.bf16.msra.mxu1 %v3219_v40  ;;  %v2180_v40 = vld [vmem:[%s4378_s3 + $0x4a0] sm:$0xff] }
 0x256   : > { %3221 = vmatprep.subr.bf16.mxu1 %v3356_v57 }
 0x259   : > { %3223 = vmatpush3.bf16.msra.mxu1 %v3222_v43  ;;  %v3282_v43 = vpack.c.bf16 %v2181_v41, %v2180_v40  ;;  %v2221_v40 = vld [vmem:[%s4378_s3 + $0x5e8] sm:$0xff] }
 0x25a   : > { %3224 = vmatprep.subr.bf16.mxu1 %v3356_v57  ;;  %v3318_v41 = vpack.c.bf16 %v2221_v40, %v2220_v39 }
 0x25d   : > { %3226 = vmatpush3.bf16.msra.mxu1 %v3225_v46  ;;  %v2182_v46 = vld [vmem:[%s4378_s3 + $0x4b0] sm:$0xff] }
 0x25e   : > { %3251 = vmatprep.subr.bf16.mxu1 %v3356_v57 }
 0x2f3   : > { %v1207_v47 = vpop.f32.mrb[4].mxu1 }
 0x2f4   : > { %v2658_v48 = vpop.f32.mrb[5].mxu1 }
 0x2f5   : > { %v3264_v48 = vpack.c.bf16 %v2201_v45, %v2200_v44 }
 0x2fb   : > { %v1277_v49 = vpop.f32.mrb[8].mxu0 }
 0x2fc   : > { %v1278_v50 = vadd.f32 %v1277_v49, %v1207_v47  ;;  %v2693_v51 = vpop.f32.mrb[9].mxu0  ;;  %v2183_v47 = vld [vmem:[%s4378_s3 + $0x4b8] sm:$0xff] }
 0x2fd   : > { %v3285_v49 = vpack.c.bf16 %v2183_v47, %v2182_v46  ;;  %v2203_v51 = vld [vmem:[%s4378_s3 + $0x558] sm:$0xff] }
 0x313   : > { %v1365_v53 = vpop.f32.mrb[6].mxu1 }
 0x314   : > { %v1369_v54 = vadd.f32 %v1365_v53, %v1278_v50  ;;  %v2728_v55 = vpop.f32.mrb[7].mxu1  ;;  %v2202_v50 = vld [vmem:[%s4378_s3 + $0x550] sm:$0xff]  ;;  %v2204_v53 = vld [vmem:[%s4378_s3 + $0x560] sm:$0xff] }
 0x315   : > { %v2184_v55 = vld [vmem:[%s4378_s3 + $0x4c0] sm:$0xff] }
 0x316   : > { %v1374_v56 = vadd.f32 %v2126_v52, %v1369_v54  ;;  %v3267_v52 = vpack.c.bf16 %v2203_v51, %v2202_v50  ;;  %v2205_v54 = vld [vmem:[%s4378_s3 + $0x568] sm:$0xff]  ;;  %v2224_v51 = vld [vmem:[%s4379_s4 + $0x3] ss:$0 sm:$0xff] }
 0x317   : > { %v3270_v58 = vpack.c.bf16 %v2205_v54, %v2204_v53 }
 0x318   : > { %v4134_v60 = vadd.f32 %v1374_v56, %v3776_v10  ;;  %v2163_v10 = vld [vmem:[%s4378_s3 + $0x420] sm:$0xff]  ;;  %v2185_v56 = vld [vmem:[%s4378_s3 + $0x4c8] sm:$0xff] }
 0x319   : > { %v3234_v3 = vpack.c.bf16 %v2164_v2, %v2163_v10  ;;  %v3288_v59 = vpack.c.bf16 %v2185_v56, %v2184_v55  ;;  %v3291_v10 = vpack.c.bf16 %v2187_v0, %v2186_v63  ;;  %v2188_v2 = vld [vmem:[%s4378_s3 + $0x4e0] sm:$0xff] }
 0x31a   : > { %v1377_v62 = vmax.f32 %v4134_v60, 0.0 }
 0x31c   : > { %1378 = vst [vmem:[#allocation4 + $0x1] sm:$0xff] %v1377_v62  ;;  %2762 = vmatmul.mubr.f32.vlgmr.msra.gmra.mrb[10].mxu0 %v1377_v62  ;;  %v2207_v62 = vld [vmem:[%s4378_s3 + $0x578] sm:$0xff] }
 0x31d   : > { %3229 = vmatpush3.bf16.msra.mxu0 %v3228_v61  ;;  %2831 = vmatprep.mubr.msk.f32.mxu0 %vm3358_vm2, %v3355_v7  ;;  %v2206_v61 = vld [vmem:[%s4378_s3 + $0x570] sm:$0xff] }
 0x31e   : > { %3230 = vmatprep.subr.bf16.mxu0 %v3356_v57 }
 0x321   : > { %3232 = vmatpush3.bf16.msra.mxu0 %v3231_v1  ;;  %v3273_v1 = vpack.c.bf16 %v2207_v62, %v2206_v61 }
 0x322   : > { %3233 = vmatprep.subr.bf16.mxu0 %v3356_v57 }
 0x323   : > { %v1379_v6 = vld [vmem:[#allocation4] sm:$0xff] }
 0x324   : > { %2797 = vmatmul.mubr.f32.vlgmr.msra.gmra.mrb[8].mxu1 %v1379_v6  ;;  %v1555_v22 = vld [vmem:[#allocation4 + $0x2] sm:$0xff] }
 0x325   : > { %3235 = vmatpush3.bf16.msra.mxu0 %v3234_v3  ;;  %2866 = vmatprep.mubr.msk.f32.mxu1 %vm3358_vm2, %v3355_v7  ;;  %v2189_v3 = vld [vmem:[%s4378_s3 + $0x4e8] sm:$0xff]  ;;  %v2191_v6 = vld [vmem:[%s4378_s3 + $0x4f8] sm:$0xff] }
 0x326   : > { %3236 = vmatprep.subr.bf16.mxu0 %v3356_v57  ;;  %3253 = vmatpush3.bf16.msra.mxu1 %v3252_v25  ;;  %v3294_v4 = vpack.c.bf16 %v2189_v3, %v2188_v2  ;;  %v2211_v25 = vld [vmem:[%s4378_s3 + $0x598] sm:$0xff] }
 0x327   : > { %3254 = vmatprep.subr.bf16.mxu1 %v3356_v57  ;;  %v3303_v26 = vpack.c.bf16 %v2211_v25, %v2210_v24 }
 0x329   : > { %3238 = vmatpush3.bf16.msra.mxu0 %v3237_v8  ;;  %v3297_v8 = vpack.c.bf16 %v2191_v6, %v2190_v5 }
 0x32a   : > { %3239 = vmatprep.subr.bf16.mxu0 %v3356_v57  ;;  %3256 = vmatpush3.bf16.msra.mxu1 %v3255_v30  ;;  %v2214_v30 = vld [vmem:[%s4378_s3 + $0x5b0] sm:$0xff] }
 0x32b   : > { %3257 = vmatprep.subr.bf16.mxu1 %v3356_v57 }
 0x32d   : > { %3241 = vmatpush3.bf16.msra.mxu0 %v3240_v12 }
 0x32e   : > { %3242 = vmatprep.subr.bf16.mxu0 %v3356_v57  ;;  %3259 = vmatpush3.bf16.msra.mxu1 %v3258_v36  ;;  %v2218_v36 = vld [vmem:[%s4378_s3 + $0x5d0] sm:$0xff] }
 0x32f   : > { %3260 = vmatprep.subr.bf16.mxu1 %v3356_v57 }
 0x331   : > { %3244 = vmatpush3.bf16.msra.mxu0 %v3243_v15  ;;  %v2175_v15 = vld [vmem:[%s4379_s4 + $0x2] ss:$0 sm:$0xff] }
 0x332   : > { %3245 = vmatprep.subr.bf16.mxu0 %v3356_v57  ;;  %3262 = vmatpush3.bf16.msra.mxu1 %v3261_v42  ;;  %v2222_v42 = vld [vmem:[%s4378_s3 + $0x5f0] sm:$0xff] }
 0x333   : > { %3263 = vmatprep.subr.bf16.mxu1 %v3356_v57 }
 0x335   : > { %3247 = vmatpush3.bf16.msra.mxu0 %v3246_v18 }
 0x336   : > { %3248 = vmatprep.subr.bf16.mxu0 %v3356_v57  ;;  %3265 = vmatpush3.bf16.msra.mxu1 %v3264_v48 }
 0x337   : > { %3266 = vmatprep.subr.bf16.mxu1 %v3356_v57 }
 0x339   : > { %3250 = vmatpush3.bf16.msra.mxu0 %v3249_v21 }
 0x33a   : > { %3275 = vmatprep.subr.bf16.mxu0 %v3356_v57  ;;  %3268 = vmatpush3.bf16.msra.mxu1 %v3267_v52 }
 0x33b   : > { %3269 = vmatprep.subr.bf16.mxu1 %v3356_v57 }
 0x33c   : > { %2832 = vmatmul.mubr.f32.vlgmr.msra.gmra.mrb[12].mxu0 %v1555_v22  ;;  %v3300_v22 = vpack.c.bf16 %v2209_v20, %v2208_v19 }
 0x33d   : > { %2901 = vmatprep.mubr.msk.f32.mxu0 %vm3358_vm2, %v3355_v7  ;;  %3277 = vmatpush3.bf16.msra.mxu0 %v3276_v32 }
 0x33e   : > { %3278 = vmatprep.subr.bf16.mxu0 %v3356_v57  ;;  %3271 = vmatpush3.bf16.msra.mxu1 %v3270_v58 }
 0x33f   : > { %3272 = vmatprep.subr.bf16.mxu1 %v3356_v57 }
 0x341   : > { %3280 = vmatpush3.bf16.msra.mxu0 %v3279_v37  ;;  %v2219_v37 = vld [vmem:[%s4378_s3 + $0x5d8] sm:$0xff] }
 0x342   : > { %3281 = vmatprep.subr.bf16.mxu0 %v3356_v57  ;;  %3274 = vmatpush3.bf16.msra.mxu1 %v3273_v1  ;;  %v3315_v38 = vpack.c.bf16 %v2219_v37, %v2218_v36 }
 0x343   : > { %3299 = vmatprep.subr.bf16.mxu1 %v3356_v57 }
 0x345   : > { %3283 = vmatpush3.bf16.msra.mxu0 %v3282_v43  ;;  %v2223_v43 = vld [vmem:[%s4378_s3 + $0x5f8] sm:$0xff] }
 0x346   : > { %3284 = vmatprep.subr.bf16.mxu0 %v3356_v57  ;;  %v3321_v44 = vpack.c.bf16 %v2223_v43, %v2222_v42 }
 0x349   : > { %3286 = vmatpush3.bf16.msra.mxu0 %v3285_v49 }
 0x34a   : > { %3287 = vmatprep.subr.bf16.mxu0 %v3356_v57 }
 0x34d   : > { %3289 = vmatpush3.bf16.msra.mxu0 %v3288_v59 }
 0x34e   : > { %3290 = vmatprep.subr.bf16.mxu0 %v3356_v57 }
 0x351   : > { %3292 = vmatpush3.bf16.msra.mxu0 %v3291_v10 }
 0x352   : > { %3293 = vmatprep.subr.bf16.mxu0 %v3356_v57 }
 0x355   : > { %3295 = vmatpush3.bf16.msra.mxu0 %v3294_v4 }
 0x356   : > { %3296 = vmatprep.subr.bf16.mxu0 %v3356_v57 }
 0x359   : > { %3298 = vmatpush3.bf16.msra.mxu0 %v3297_v8 }
 0x3ef   : > { %v1481_v9 = vpop.f32.mrb[10].mxu0 }
 0x3f0   : > { %v2763_v11 = vpop.f32.mrb[11].mxu0 }
 0x3f7   : > { %v1551_v12 = vpop.f32.mrb[8].mxu1 }
 0x3f8   : > { %v1552_v13 = vadd.f32 %v1551_v12, %v1481_v9  ;;  %v2798_v14 = vpop.f32.mrb[9].mxu1 }
 0x40f   : > { %v1639_v16 = vpop.f32.mrb[12].mxu0 }
 0x410   : > { %v1643_v17 = vadd.f32 %v1639_v16, %v1552_v13  ;;  %v2833_v18 = vpop.f32.mrb[13].mxu0 }
 0x412   : > { %v1648_v21 = vadd.f32 %v2175_v15, %v1643_v17 }
 0x414   : > { %v1650_v23 = vmax.f32 %v1648_v21, 0.0 }
 0x416   : > { %1651 = vst [vmem:[#allocation4 + $0x1] sm:$0xff] %v1650_v23  ;;  %2867 = vmatmul.mubr.f32.vlgmr.msra.gmra.mrb[10].mxu1 %v1650_v23 }
 0x417   : > { %3301 = vmatpush3.bf16.msra.mxu1 %v3300_v22  ;;  %2936 = vmatprep.mubr.msk.f32.mxu1 %vm3358_vm2, %v3355_v7  ;;  %v2215_v7 = vld [vmem:[%s4378_s3 + $0x5b8] sm:$0xff] }
 0x418   : > { %3302 = vmatprep.subr.bf16.mxu1 %v3356_v57  ;;  %v3309_v32 = vpack.c.bf16 %v2215_v7, %v2214_v30 }
 0x41b   : > { %3304 = vmatpush3.bf16.msra.mxu1 %v3303_v26 }
 0x41c   : > { %3305 = vmatprep.subr.bf16.mxu1 %v3356_v57 }
 0x41d   : > { %v1652_v31 = vld [vmem:[#allocation4] sm:$0xff] }
 0x41e   : > { %2902 = vmatmul.mubr.f32.vlgmr.msra.gmra.mrb[14].mxu0 %v1652_v31  ;;  %v1828_v45 = vld [vmem:[#allocation4 + $0x2] sm:$0xff] }
 0x41f   : > { %3307 = vmatpush3.bf16.msra.mxu1 %v3306_v29 }
 0x420   : > { %3308 = vmatprep.subr.bf16.mxu1 %v3356_v57 }
 0x423   : > { %3310 = vmatpush3.bf16.msra.mxu1 %v3309_v32 }
 0x424   : > { %3311 = vmatprep.subr.bf16.mxu1 %v3356_v57 }
 0x427   : > { %3313 = vmatpush3.bf16.msra.mxu1 %v3312_v35 }
 0x428   : > { %3314 = vmatprep.subr.bf16.mxu1 %v3356_v57 }
 0x42b   : > { %3316 = vmatpush3.bf16.msra.mxu1 %v3315_v38 }
 0x42c   : > { %3317 = vmatprep.subr.bf16.mxu1 %v3356_v57 }
 0x42f   : > { %3319 = vmatpush3.bf16.msra.mxu1 %v3318_v41 }
 0x430   : > { %3320 = vmatprep.subr.bf16.mxu1 %v3356_v57 }
 0x433   : > { %3322 = vmatpush3.bf16.msra.mxu1 %v3321_v44 }
 0x436   : > { %2937 = vmatmul.mubr.f32.vlgmr.msra.gmra.mrb[12].mxu1 %v1828_v45 }
 0x4e9   : > { %v1754_v46 = vpop.f32.mrb[10].mxu1 }
 0x4ea   : > { %v2868_v47 = vpop.f32.mrb[11].mxu1 }
 0x4f1   : > { %v1824_v48 = vpop.f32.mrb[14].mxu0 }
 0x4f2   : > { %v1825_v49 = vadd.f32 %v1824_v48, %v1754_v46  ;;  %v2903_v50 = vpop.f32.mrb[15].mxu0 }
 0x509   : > { %v1912_v52 = vpop.f32.mrb[12].mxu1 }
 0x50a   : > { %v1916_v53 = vadd.f32 %v1912_v52, %v1825_v49  ;;  %v2938_v54 = vpop.f32.mrb[13].mxu1 }
 0x50c   : > { %v1921_v55 = vadd.f32 %v2224_v51, %v1916_v53 }
 0x50e   : > { %v1922_v57 = vadd.f32 %v1921_v55, %v4134_v60 }
 0x510   : > { %1923 = vst [vmem:[%s222_s12] sm:$0xff] %v1922_v57 }
 0x511 PF: > { %s15_s18 = sadd.s32 1, %s3353_s18  }
 0x512   : > { %p12_p4 = scmp.ge.s32.totalorder %s15_s18, 4  }
 0x514   :  { %14 = sbr.rel (!%p12_p4) target bundleno = 1 (0x1), region = 85 }

</bundles_post_ra>
